<compile_context>
chip_gen: v7x
topology: tpu7x:2x2x1
jax: 0.10.0
libtpu: 0.0.40
codegen_flags: <defaults>
</compile_context>

<pallas_src>
import functools
import math

import jax
import jax.numpy as jnp
from jax.experimental import pallas as pl
from jax.experimental.pallas import tpu as pltpu


# ------------------------------------------------------------------ kernel

def _fused_encoder_kernel(
        x_ref, m_ref,
        wqkv_ref, bqkv_ref, wo_ref, bo_ref,
        w1_ref, b1_ref, w2_ref, b2_ref,
        ln1g_ref, ln1b_ref, ln2g_ref, ln2b_ref,
        wmu_ref, bmu_ref, wlv_ref, blv_ref,
        mean_ref, logvar_ref,
        *, num_layers, heads, head_dim, num_latents, eps, scale):
    """One grid step = one batch element.  Runs the whole encoder stack."""
    x = x_ref[0].astype(jnp.float32)              # (L, E)
    key_valid = m_ref[0] > 0.5                    # (1, L) bool, True = valid key
    E = heads * head_dim
    neg = jnp.float32(-1e30)

    def layer_norm(y, g, b):
        mu = jnp.mean(y, axis=-1, keepdims=True)
        var = jnp.mean((y - mu) ** 2, axis=-1, keepdims=True)
        return (y - mu) * jax.lax.rsqrt(var + eps) * g + b

    for l in range(num_layers):                   # static unroll over layers
        # ---- fused QKV projection: one (L,E) @ (E,3E) matmul ----
        qkv = (jnp.dot(x, wqkv_ref[l], preferred_element_type=jnp.float32)
               + bqkv_ref[l])                     # (L, 3E)
        wo_l = wo_ref[l]                          # (E, E)

        # ---- multi-head attention, heads statically unrolled ----
        attn = None
        for h in range(heads):
            lo = h * head_dim
            hi = lo + head_dim
            qh = qkv[:, lo:hi]                    # (L, Dh)
            kh = qkv[:, E + lo:E + hi]            # (L, Dh)
            vh = qkv[:, 2 * E + lo:2 * E + hi]    # (L, Dh)
            # scores: contract over head_dim without an explicit transpose
            s = jax.lax.dot_general(
                qh, kh, (((1,), (1,)), ((), ())),
                preferred_element_type=jnp.float32) * scale      # (L, L)
            s = jnp.where(key_valid, s, neg)      # key-padding mask
            s = s - jnp.max(s, axis=-1, keepdims=True)
            p = jnp.exp(s)
            p = p * pl.reciprocal(jnp.sum(p, axis=-1, keepdims=True),
                                  approx=True)
            oh = jnp.dot(p, vh, preferred_element_type=jnp.float32)  # (L, Dh)
            # concat_h(oh) @ Wo  ==  sum_h  oh @ Wo[h*Dh:(h+1)*Dh, :]
            contrib = jnp.dot(oh, wo_l[lo:hi, :],
                              preferred_element_type=jnp.float32)    # (L, E)
            attn = contrib if attn is None else attn + contrib
        attn = attn + bo_ref[l]

        # ---- post-norm residual blocks (dropout omitted: eval mode) ----
        h1 = layer_norm(attn + x, ln1g_ref[l], ln1b_ref[l])
        ff = (jnp.dot(h1, w1_ref[l], preferred_element_type=jnp.float32)
              + b1_ref[l])
        ff = jnp.maximum(ff, 0.0)
        ff = (jnp.dot(ff, w2_ref[l], preferred_element_type=jnp.float32)
              + b2_ref[l])
        x = layer_norm(ff + h1, ln2g_ref[l], ln2b_ref[l])

    # ---- latent-token read-out heads ----
    nl = num_latents
    mu_in = x[0:nl, :]                            # (nl, E)
    lv_in = x[nl:2 * nl, :]                       # (nl, E)
    mean_ref[0] = (jnp.dot(mu_in, wmu_ref[...],
                           preferred_element_type=jnp.float32)
                   + bmu_ref[...]).astype(mean_ref.dtype)
    logvar_ref[0] = (jnp.dot(lv_in, wlv_ref[...],
                             preferred_element_type=jnp.float32)
                     + blv_ref[...]).astype(logvar_ref.dtype)


# ------------------------------------------------------------ parameter init

def init_params(key, src_vocab_size, embed_size, dim_latent, num_latents,
                num_layers, heads, forward_expansion, max_length):
    assert embed_size % heads == 0
    hid = forward_expansion * embed_size
    (k_tok, k_pos, k_dist, k_qkv, k_o, k_1, k_2, k_mu, k_lv,
     _unused) = jax.random.split(key, 10)

    def nrm(k, shape, std=0.02):
        return std * jax.random.normal(k, shape, jnp.float32)

    return {
        "heads": heads,
        "num_latents": num_latents,
        "tok_emb": nrm(k_tok, (src_vocab_size, embed_size)),
        "pos_emb": nrm(k_pos, (max_length, embed_size)),
        "dist_tokens": nrm(k_dist, (2 * num_latents, embed_size)),
        # per-layer weights stacked on a leading num_layers axis so the whole
        # transformer stack runs inside ONE pallas_call.
        "wqkv": nrm(k_qkv, (num_layers, embed_size, 3 * embed_size)),
        "bqkv": jnp.zeros((num_layers, 1, 3 * embed_size), jnp.float32),
        "wo": nrm(k_o, (num_layers, embed_size, embed_size)),
        "bo": jnp.zeros((num_layers, 1, embed_size), jnp.float32),
        "w1": nrm(k_1, (num_layers, embed_size, hid)),
        "b1": jnp.zeros((num_layers, 1, hid), jnp.float32),
        "w2": nrm(k_2, (num_layers, hid, embed_size)),
        "b2": jnp.zeros((num_layers, 1, embed_size), jnp.float32),
        "ln1_g": jnp.ones((num_layers, 1, embed_size), jnp.float32),
        "ln1_b": jnp.zeros((num_layers, 1, embed_size), jnp.float32),
        "ln2_g": jnp.ones((num_layers, 1, embed_size), jnp.float32),
        "ln2_b": jnp.zeros((num_layers, 1, embed_size), jnp.float32),
        "w_mu": nrm(k_mu, (embed_size, dim_latent)),
        "b_mu": jnp.zeros((1, dim_latent), jnp.float32),
        "w_lv": nrm(k_lv, (embed_size, dim_latent)),
        "b_lv": jnp.zeros((1, dim_latent), jnp.float32),
    }


# --------------------------------------------------------------- forward pass

def motion_encoder_forward(params, motion, motion_mask):
    """motion: (B, T) int32 token ids; motion_mask: (B, T) 1=valid, 0=pad.
    Returns (out_mean, out_logvar), each (B, num_latents, dim_latent)."""
    B, T = motion.shape
    E = params["tok_emb"].shape[1]
    H = params["heads"]
    Dh = E // H
    nl = params["num_latents"]
    num_layers = params["wqkv"].shape[0]
    dl = params["w_mu"].shape[1]

    # ---- embedding glue (gathers / broadcasts stay in XLA) ----
    tok = jnp.take(params["tok_emb"], motion, axis=0)                 # (B, T, E)
    pos = params["pos_emb"][:T][None, :, :]                           # (1, T, E)
    lat = jnp.broadcast_to(params["dist_tokens"][None], (B, 2 * nl, E))
    x = jnp.concatenate([lat, tok + pos], axis=1).astype(jnp.float32)  # (B, L, E)
    L = x.shape[1]
    key_mask = jnp.concatenate(
        [jnp.ones((B, 2 * nl), jnp.float32), motion_mask.astype(jnp.float32)],
        axis=1)[:, None, :]                                            # (B, 1, L)

    def full(shape):
        return pl.BlockSpec(shape, lambda b, _s=shape: (0,) * len(_s))

    kernel = functools.partial(
        _fused_encoder_kernel,
        num_layers=num_layers, heads=H, head_dim=Dh, num_latents=nl,
        eps=1e-5, scale=1.0 / math.sqrt(Dh))

    out_mean, out_logvar = pl.pallas_call(
        kernel,
        out_shape=(jax.ShapeDtypeStruct((B, nl, dl), jnp.float32),
                   jax.ShapeDtypeStruct((B, nl, dl), jnp.float32)),
        grid=(B,),
        in_specs=[
            pl.BlockSpec((1, L, E), lambda b: (b, 0, 0)),   # x, one batch elem
            pl.BlockSpec((1, 1, L), lambda b: (b, 0, 0)),   # key mask
            full(params["wqkv"].shape), full(params["bqkv"].shape),
            full(params["wo"].shape), full(params["bo"].shape),
            full(params["w1"].shape), full(params["b1"].shape),
            full(params["w2"].shape), full(params["b2"].shape),
            full(params["ln1_g"].shape), full(params["ln1_b"].shape),
            full(params["ln2_g"].shape), full(params["ln2_b"].shape),
            full(params["w_mu"].shape), full(params["b_mu"].shape),
            full(params["w_lv"].shape), full(params["b_lv"].shape),
        ],
        out_specs=(pl.BlockSpec((1, nl, dl), lambda b: (b, 0, 0)),
                   pl.BlockSpec((1, nl, dl), lambda b: (b, 0, 0))),
        compiler_params=pltpu.CompilerParams(
            dimension_semantics=("parallel",)),
    )(x, key_mask,
      params["wqkv"], params["bqkv"], params["wo"], params["bo"],
      params["w1"], params["b1"], params["w2"], params["b2"],
      params["ln1_g"], params["ln1_b"], params["ln2_g"], params["ln2_b"],
      params["w_mu"], params["b_mu"], params["w_lv"], params["b_lv"])
    return out_mean, out_logvar


# ----------------------------------------------------------------------- main

if __name__ == "__main__":
    # module hyper-parameters (small but consistent with the constructor)
    src_vocab_size = 50
    embed_size = 32
    dim_latent = 16
    num_latents = 2
    num_layers = 2
    heads = 4
    forward_expansion = 2
    max_length = 16

    key = jax.random.PRNGKey(0)
    k_params, k_motion = jax.random.split(key)
    params = init_params(k_params, src_vocab_size, embed_size, dim_latent,
                         num_latents, num_layers, heads, forward_expansion,
                         max_length)

    B, T = 2, 8
    motion = jax.random.randint(k_motion, (B, T), 0, src_vocab_size, jnp.int32)
    # second sequence has 2 padded positions at the end
    motion_mask = jnp.array([[1, 1, 1, 1, 1, 1, 1, 1],
                             [1, 1, 1, 1, 1, 1, 0, 0]], jnp.float32)

    out_mean, out_logvar = motion_encoder_forward(params, motion, motion_mask)
    jax.block_until_ready((out_mean, out_logvar))

    assert out_mean.shape == (B, num_latents, dim_latent)
    assert out_logvar.shape == (B, num_latents, dim_latent)
    assert bool(jnp.all(jnp.isfinite(out_mean)))
    assert bool(jnp.all(jnp.isfinite(out_logvar)))
    print("KERNEL_OK")
</pallas_src>

<mosaic_0001>
module attributes {stable_mosaic.version = 11 : i64} {
  func.func @_fused_encoder_kernel(%arg0: i32, %arg1: memref<1x12x32xf32, #tpu.memory_space<vmem>>, %arg2: memref<1x1x12xf32, #tpu.memory_space<vmem>>, %arg3: memref<2x32x96xf32, #tpu.memory_space<vmem>>, %arg4: memref<2x1x96xf32, #tpu.memory_space<vmem>>, %arg5: memref<2x32x32xf32, #tpu.memory_space<vmem>>, %arg6: memref<2x1x32xf32, #tpu.memory_space<vmem>>, %arg7: memref<2x32x64xf32, #tpu.memory_space<vmem>>, %arg8: memref<2x1x64xf32, #tpu.memory_space<vmem>>, %arg9: memref<2x64x32xf32, #tpu.memory_space<vmem>>, %arg10: memref<2x1x32xf32, #tpu.memory_space<vmem>>, %arg11: memref<2x1x32xf32, #tpu.memory_space<vmem>>, %arg12: memref<2x1x32xf32, #tpu.memory_space<vmem>>, %arg13: memref<2x1x32xf32, #tpu.memory_space<vmem>>, %arg14: memref<2x1x32xf32, #tpu.memory_space<vmem>>, %arg15: memref<32x16xf32, #tpu.memory_space<vmem>>, %arg16: memref<1x16xf32, #tpu.memory_space<vmem>>, %arg17: memref<32x16xf32, #tpu.memory_space<vmem>>, %arg18: memref<1x16xf32, #tpu.memory_space<vmem>>, %arg19: memref<1x2x16xf32, #tpu.memory_space<vmem>>, %arg20: memref<1x2x16xf32, #tpu.memory_space<vmem>>) attributes {dimension_semantics = [#tpu.dimension_semantics<parallel>], iteration_bounds = array<i64: 2>, scalar_prefetch = 0 : i64, scratch_operands = 0 : i64, tpu.core_type = #tpu.core_type<tc>, window_params = [{transform_indices = @transform_0, window_bounds = array<i64: 1, 12, 32>}, {transform_indices = @transform_1, window_bounds = array<i64: 1, 1, 12>}, {pipeline_mode = #tpu.pipeline_mode<synchronous>, transform_indices = @transform_2, window_bounds = array<i64: 2, 32, 96>}, {pipeline_mode = #tpu.pipeline_mode<synchronous>, transform_indices = @transform_3, window_bounds = array<i64: 2, 1, 96>}, {pipeline_mode = #tpu.pipeline_mode<synchronous>, transform_indices = @transform_4, window_bounds = array<i64: 2, 32, 32>}, {pipeline_mode = #tpu.pipeline_mode<synchronous>, transform_indices = @transform_5, window_bounds = array<i64: 2, 1, 32>}, {pipeline_mode = #tpu.pipeline_mode<synchronous>, transform_indices = @transform_6, window_bounds = array<i64: 2, 32, 64>}, {pipeline_mode = #tpu.pipeline_mode<synchronous>, transform_indices = @transform_7, window_bounds = array<i64: 2, 1, 64>}, {pipeline_mode = #tpu.pipeline_mode<synchronous>, transform_indices = @transform_8, window_bounds = array<i64: 2, 64, 32>}, {pipeline_mode = #tpu.pipeline_mode<synchronous>, transform_indices = @transform_9, window_bounds = array<i64: 2, 1, 32>}, {pipeline_mode = #tpu.pipeline_mode<synchronous>, transform_indices = @transform_10, window_bounds = array<i64: 2, 1, 32>}, {pipeline_mode = #tpu.pipeline_mode<synchronous>, transform_indices = @transform_11, window_bounds = array<i64: 2, 1, 32>}, {pipeline_mode = #tpu.pipeline_mode<synchronous>, transform_indices = @transform_12, window_bounds = array<i64: 2, 1, 32>}, {pipeline_mode = #tpu.pipeline_mode<synchronous>, transform_indices = @transform_13, window_bounds = array<i64: 2, 1, 32>}, {pipeline_mode = #tpu.pipeline_mode<synchronous>, transform_indices = @transform_14, window_bounds = array<i64: 32, 16>}, {pipeline_mode = #tpu.pipeline_mode<synchronous>, transform_indices = @transform_15, window_bounds = array<i64: 1, 16>}, {pipeline_mode = #tpu.pipeline_mode<synchronous>, transform_indices = @transform_16, window_bounds = array<i64: 32, 16>}, {pipeline_mode = #tpu.pipeline_mode<synchronous>, transform_indices = @transform_17, window_bounds = array<i64: 1, 16>}, {transform_indices = @transform_18, window_bounds = array<i64: 1, 2, 16>}, {transform_indices = @transform_19, window_bounds = array<i64: 1, 2, 16>}]} {
    %c0 = arith.constant 0 : index
    %c0_0 = arith.constant 0 : index
    %c0_1 = arith.constant 0 : index
    %0 = vector.load %arg1[%c0, %c0_0, %c0_1] : memref<1x12x32xf32, #tpu.memory_space<vmem>>, vector<1x12x32xf32>
    %1 = vector.shape_cast %0 : vector<1x12x32xf32> to vector<12x32xf32>
    %c0_2 = arith.constant 0 : index
    %c0_3 = arith.constant 0 : index
    %c0_4 = arith.constant 0 : index
    %2 = vector.load %arg2[%c0_2, %c0_3, %c0_4] : memref<1x1x12xf32, #tpu.memory_space<vmem>>, vector<1x1x12xf32>
    %3 = vector.shape_cast %2 : vector<1x1x12xf32> to vector<1x12xf32>
    %cst = arith.constant 5.000000e-01 : f32
    %4 = vector.broadcast %cst : f32 to vector<1x12xf32>
    %5 = arith.cmpf ogt, %3, %4 : vector<1x12xf32>
    %c0_5 = arith.constant 0 : index
    %c0_6 = arith.constant 0 : index
    %c0_7 = arith.constant 0 : index
    %6 = vector.load %arg3[%c0_5, %c0_6, %c0_7] : memref<2x32x96xf32, #tpu.memory_space<vmem>>, vector<1x32x96xf32>
    %7 = vector.shape_cast %6 : vector<1x32x96xf32> to vector<32x96xf32>
    %cst_8 = arith.constant dense<0.000000e+00> : vector<12x96xf32>
    %8 = tpu.matmul %1, %7, %cst_8 {dimension_numbers = #tpu.dot_dimension_numbers<[1], [0], [0], [1], [0, 0, 1, 1], [], []>} : vector<12x32xf32>, vector<32x96xf32>, vector<12x96xf32> -> vector<12x96xf32>
    %c0_9 = arith.constant 0 : index
    %c0_10 = arith.constant 0 : index
    %c0_11 = arith.constant 0 : index
    %9 = vector.load %arg4[%c0_9, %c0_10, %c0_11] : memref<2x1x96xf32, #tpu.memory_space<vmem>>, vector<1x1x96xf32>
    %10 = vector.shape_cast %9 : vector<1x1x96xf32> to vector<1x96xf32>
    %11 = vector.broadcast %10 : vector<1x96xf32> to vector<12x96xf32>
    %12 = arith.addf %8, %11 : vector<12x96xf32>
    %c0_12 = arith.constant 0 : index
    %c0_13 = arith.constant 0 : index
    %c0_14 = arith.constant 0 : index
    %13 = vector.load %arg5[%c0_12, %c0_13, %c0_14] : memref<2x32x32xf32, #tpu.memory_space<vmem>>, vector<1x32x32xf32>
    %14 = vector.shape_cast %13 : vector<1x32x32xf32> to vector<32x32xf32>
    %15 = vector.extract_strided_slice %12 {offsets = [0, 0], sizes = [12, 8], strides = [1, 1]} : vector<12x96xf32> to vector<12x8xf32>
    %16 = vector.extract_strided_slice %12 {offsets = [0, 32], sizes = [12, 8], strides = [1, 1]} : vector<12x96xf32> to vector<12x8xf32>
    %17 = vector.extract_strided_slice %12 {offsets = [0, 64], sizes = [12, 8], strides = [1, 1]} : vector<12x96xf32> to vector<12x8xf32>
    %cst_15 = arith.constant dense<0.000000e+00> : vector<12x12xf32>
    %18 = tpu.matmul %15, %16, %cst_15 {dimension_numbers = #tpu.dot_dimension_numbers<[1], [1], [0], [0], [0, 0, 1, 0], [], []>} : vector<12x8xf32>, vector<12x8xf32>, vector<12x12xf32> -> vector<12x12xf32>
    %cst_16 = arith.constant 0.353553385 : f32
    %19 = vector.broadcast %cst_16 : f32 to vector<12x12xf32>
    %20 = arith.mulf %18, %19 : vector<12x12xf32>
    %cst_17 = arith.constant -1.000000e+30 : f32
    %21 = vector.shape_cast %5 : vector<1x12xi1> to vector<1x12xi1>
    %22 = vector.broadcast %21 : vector<1x12xi1> to vector<12x12xi1>
    %23 = vector.broadcast %cst_17 : f32 to vector<12x12xf32>
    %24 = arith.select %22, %20, %23 : vector<12x12xi1>, vector<12x12xf32>
    %cst_18 = arith.constant dense<0xFF800000> : vector<12xf32>
    %25 = vector.multi_reduction <maximumf>, %24, %cst_18 [1] : vector<12x12xf32> to vector<12xf32>
    %26 = vector.shape_cast %25 : vector<12xf32> to vector<12x1xf32>
    %27 = vector.broadcast %26 : vector<12x1xf32> to vector<12x12xf32>
    %28 = arith.subf %24, %27 : vector<12x12xf32>
    %29 = math.exp %28 : vector<12x12xf32>
    %cst_19 = arith.constant dense<0.000000e+00> : vector<12xf32>
    %30 = vector.multi_reduction <add>, %29, %cst_19 [1] : vector<12x12xf32> to vector<12xf32>
    %31 = vector.shape_cast %30 : vector<12xf32> to vector<12x1xf32>
    %32 = tpu.reciprocal %31 {approx = true} : vector<12x1xf32> -> vector<12x1xf32>
    %33 = vector.broadcast %32 : vector<12x1xf32> to vector<12x12xf32>
    %34 = arith.mulf %29, %33 : vector<12x12xf32>
    %cst_20 = arith.constant dense<0.000000e+00> : vector<12x8xf32>
    %35 = tpu.matmul %34, %17, %cst_20 {dimension_numbers = #tpu.dot_dimension_numbers<[1], [0], [0], [1], [0, 0, 1, 1], [], []>} : vector<12x12xf32>, vector<12x8xf32>, vector<12x8xf32> -> vector<12x8xf32>
    %36 = vector.extract_strided_slice %14 {offsets = [0, 0], sizes = [8, 32], strides = [1, 1]} : vector<32x32xf32> to vector<8x32xf32>
    %cst_21 = arith.constant dense<0.000000e+00> : vector<12x32xf32>
    %37 = tpu.matmul %35, %36, %cst_21 {dimension_numbers = #tpu.dot_dimension_numbers<[1], [0], [0], [1], [0, 0, 1, 1], [], []>} : vector<12x8xf32>, vector<8x32xf32>, vector<12x32xf32> -> vector<12x32xf32>
    %38 = vector.extract_strided_slice %12 {offsets = [0, 8], sizes = [12, 8], strides = [1, 1]} : vector<12x96xf32> to vector<12x8xf32>
    %39 = vector.extract_strided_slice %12 {offsets = [0, 40], sizes = [12, 8], strides = [1, 1]} : vector<12x96xf32> to vector<12x8xf32>
    %40 = vector.extract_strided_slice %12 {offsets = [0, 72], sizes = [12, 8], strides = [1, 1]} : vector<12x96xf32> to vector<12x8xf32>
    %cst_22 = arith.constant dense<0.000000e+00> : vector<12x12xf32>
    %41 = tpu.matmul %38, %39, %cst_22 {dimension_numbers = #tpu.dot_dimension_numbers<[1], [1], [0], [0], [0, 0, 1, 0], [], []>} : vector<12x8xf32>, vector<12x8xf32>, vector<12x12xf32> -> vector<12x12xf32>
    %cst_23 = arith.constant 0.353553385 : f32
    %42 = vector.broadcast %cst_23 : f32 to vector<12x12xf32>
    %43 = arith.mulf %41, %42 : vector<12x12xf32>
    %cst_24 = arith.constant -1.000000e+30 : f32
    %44 = vector.shape_cast %5 : vector<1x12xi1> to vector<1x12xi1>
    %45 = vector.broadcast %44 : vector<1x12xi1> to vector<12x12xi1>
    %46 = vector.broadcast %cst_24 : f32 to vector<12x12xf32>
    %47 = arith.select %45, %43, %46 : vector<12x12xi1>, vector<12x12xf32>
    %cst_25 = arith.constant dense<0xFF800000> : vector<12xf32>
    %48 = vector.multi_reduction <maximumf>, %47, %cst_25 [1] : vector<12x12xf32> to vector<12xf32>
    %49 = vector.shape_cast %48 : vector<12xf32> to vector<12x1xf32>
    %50 = vector.broadcast %49 : vector<12x1xf32> to vector<12x12xf32>
    %51 = arith.subf %47, %50 : vector<12x12xf32>
    %52 = math.exp %51 : vector<12x12xf32>
    %cst_26 = arith.constant dense<0.000000e+00> : vector<12xf32>
    %53 = vector.multi_reduction <add>, %52, %cst_26 [1] : vector<12x12xf32> to vector<12xf32>
    %54 = vector.shape_cast %53 : vector<12xf32> to vector<12x1xf32>
    %55 = tpu.reciprocal %54 {approx = true} : vector<12x1xf32> -> vector<12x1xf32>
    %56 = vector.broadcast %55 : vector<12x1xf32> to vector<12x12xf32>
    %57 = arith.mulf %52, %56 : vector<12x12xf32>
    %cst_27 = arith.constant dense<0.000000e+00> : vector<12x8xf32>
    %58 = tpu.matmul %57, %40, %cst_27 {dimension_numbers = #tpu.dot_dimension_numbers<[1], [0], [0], [1], [0, 0, 1, 1], [], []>} : vector<12x12xf32>, vector<12x8xf32>, vector<12x8xf32> -> vector<12x8xf32>
    %59 = vector.extract_strided_slice %14 {offsets = [8, 0], sizes = [8, 32], strides = [1, 1]} : vector<32x32xf32> to vector<8x32xf32>
    %cst_28 = arith.constant dense<0.000000e+00> : vector<12x32xf32>
    %60 = tpu.matmul %58, %59, %cst_28 {dimension_numbers = #tpu.dot_dimension_numbers<[1], [0], [0], [1], [0, 0, 1, 1], [], []>} : vector<12x8xf32>, vector<8x32xf32>, vector<12x32xf32> -> vector<12x32xf32>
    %61 = arith.addf %37, %60 : vector<12x32xf32>
    %62 = vector.extract_strided_slice %12 {offsets = [0, 16], sizes = [12, 8], strides = [1, 1]} : vector<12x96xf32> to vector<12x8xf32>
    %63 = vector.extract_strided_slice %12 {offsets = [0, 48], sizes = [12, 8], strides = [1, 1]} : vector<12x96xf32> to vector<12x8xf32>
    %64 = vector.extract_strided_slice %12 {offsets = [0, 80], sizes = [12, 8], strides = [1, 1]} : vector<12x96xf32> to vector<12x8xf32>
    %cst_29 = arith.constant dense<0.000000e+00> : vector<12x12xf32>
    %65 = tpu.matmul %62, %63, %cst_29 {dimension_numbers = #tpu.dot_dimension_numbers<[1], [1], [0], [0], [0, 0, 1, 0], [], []>} : vector<12x8xf32>, vector<12x8xf32>, vector<12x12xf32> -> vector<12x12xf32>
    %cst_30 = arith.constant 0.353553385 : f32
    %66 = vector.broadcast %cst_30 : f32 to vector<12x12xf32>
    %67 = arith.mulf %65, %66 : vector<12x12xf32>
    %cst_31 = arith.constant -1.000000e+30 : f32
    %68 = vector.shape_cast %5 : vector<1x12xi1> to vector<1x12xi1>
    %69 = vector.broadcast %68 : vector<1x12xi1> to vector<12x12xi1>
    %70 = vector.broadcast %cst_31 : f32 to vector<12x12xf32>
    %71 = arith.select %69, %67, %70 : vector<12x12xi1>, vector<12x12xf32>
    %cst_32 = arith.constant dense<0xFF800000> : vector<12xf32>
    %72 = vector.multi_reduction <maximumf>, %71, %cst_32 [1] : vector<12x12xf32> to vector<12xf32>
    %73 = vector.shape_cast %72 : vector<12xf32> to vector<12x1xf32>
    %74 = vector.broadcast %73 : vector<12x1xf32> to vector<12x12xf32>
    %75 = arith.subf %71, %74 : vector<12x12xf32>
    %76 = math.exp %75 : vector<12x12xf32>
    %cst_33 = arith.constant dense<0.000000e+00> : vector<12xf32>
    %77 = vector.multi_reduction <add>, %76, %cst_33 [1] : vector<12x12xf32> to vector<12xf32>
    %78 = vector.shape_cast %77 : vector<12xf32> to vector<12x1xf32>
    %79 = tpu.reciprocal %78 {approx = true} : vector<12x1xf32> -> vector<12x1xf32>
    %80 = vector.broadcast %79 : vector<12x1xf32> to vector<12x12xf32>
    %81 = arith.mulf %76, %80 : vector<12x12xf32>
    %cst_34 = arith.constant dense<0.000000e+00> : vector<12x8xf32>
    %82 = tpu.matmul %81, %64, %cst_34 {dimension_numbers = #tpu.dot_dimension_numbers<[1], [0], [0], [1], [0, 0, 1, 1], [], []>} : vector<12x12xf32>, vector<12x8xf32>, vector<12x8xf32> -> vector<12x8xf32>
    %83 = vector.extract_strided_slice %14 {offsets = [16, 0], sizes = [8, 32], strides = [1, 1]} : vector<32x32xf32> to vector<8x32xf32>
    %cst_35 = arith.constant dense<0.000000e+00> : vector<12x32xf32>
    %84 = tpu.matmul %82, %83, %cst_35 {dimension_numbers = #tpu.dot_dimension_numbers<[1], [0], [0], [1], [0, 0, 1, 1], [], []>} : vector<12x8xf32>, vector<8x32xf32>, vector<12x32xf32> -> vector<12x32xf32>
    %85 = arith.addf %61, %84 : vector<12x32xf32>
    %86 = vector.extract_strided_slice %12 {offsets = [0, 24], sizes = [12, 8], strides = [1, 1]} : vector<12x96xf32> to vector<12x8xf32>
    %87 = vector.extract_strided_slice %12 {offsets = [0, 56], sizes = [12, 8], strides = [1, 1]} : vector<12x96xf32> to vector<12x8xf32>
    %88 = vector.extract_strided_slice %12 {offsets = [0, 88], sizes = [12, 8], strides = [1, 1]} : vector<12x96xf32> to vector<12x8xf32>
    %cst_36 = arith.constant dense<0.000000e+00> : vector<12x12xf32>
    %89 = tpu.matmul %86, %87, %cst_36 {dimension_numbers = #tpu.dot_dimension_numbers<[1], [1], [0], [0], [0, 0, 1, 0], [], []>} : vector<12x8xf32>, vector<12x8xf32>, vector<12x12xf32> -> vector<12x12xf32>
    %cst_37 = arith.constant 0.353553385 : f32
    %90 = vector.broadcast %cst_37 : f32 to vector<12x12xf32>
    %91 = arith.mulf %89, %90 : vector<12x12xf32>
    %cst_38 = arith.constant -1.000000e+30 : f32
    %92 = vector.shape_cast %5 : vector<1x12xi1> to vector<1x12xi1>
    %93 = vector.broadcast %92 : vector<1x12xi1> to vector<12x12xi1>
    %94 = vector.broadcast %cst_38 : f32 to vector<12x12xf32>
    %95 = arith.select %93, %91, %94 : vector<12x12xi1>, vector<12x12xf32>
    %cst_39 = arith.constant dense<0xFF800000> : vector<12xf32>
    %96 = vector.multi_reduction <maximumf>, %95, %cst_39 [1] : vector<12x12xf32> to vector<12xf32>
    %97 = vector.shape_cast %96 : vector<12xf32> to vector<12x1xf32>
    %98 = vector.broadcast %97 : vector<12x1xf32> to vector<12x12xf32>
    %99 = arith.subf %95, %98 : vector<12x12xf32>
    %100 = math.exp %99 : vector<12x12xf32>
    %cst_40 = arith.constant dense<0.000000e+00> : vector<12xf32>
    %101 = vector.multi_reduction <add>, %100, %cst_40 [1] : vector<12x12xf32> to vector<12xf32>
    %102 = vector.shape_cast %101 : vector<12xf32> to vector<12x1xf32>
    %103 = tpu.reciprocal %102 {approx = true} : vector<12x1xf32> -> vector<12x1xf32>
    %104 = vector.broadcast %103 : vector<12x1xf32> to vector<12x12xf32>
    %105 = arith.mulf %100, %104 : vector<12x12xf32>
    %cst_41 = arith.constant dense<0.000000e+00> : vector<12x8xf32>
    %106 = tpu.matmul %105, %88, %cst_41 {dimension_numbers = #tpu.dot_dimension_numbers<[1], [0], [0], [1], [0, 0, 1, 1], [], []>} : vector<12x12xf32>, vector<12x8xf32>, vector<12x8xf32> -> vector<12x8xf32>
    %107 = vector.extract_strided_slice %14 {offsets = [24, 0], sizes = [8, 32], strides = [1, 1]} : vector<32x32xf32> to vector<8x32xf32>
    %cst_42 = arith.constant dense<0.000000e+00> : vector<12x32xf32>
    %108 = tpu.matmul %106, %107, %cst_42 {dimension_numbers = #tpu.dot_dimension_numbers<[1], [0], [0], [1], [0, 0, 1, 1], [], []>} : vector<12x8xf32>, vector<8x32xf32>, vector<12x32xf32> -> vector<12x32xf32>
    %109 = arith.addf %85, %108 : vector<12x32xf32>
    %c0_43 = arith.constant 0 : index
    %c0_44 = arith.constant 0 : index
    %c0_45 = arith.constant 0 : index
    %110 = vector.load %arg6[%c0_43, %c0_44, %c0_45] : memref<2x1x32xf32, #tpu.memory_space<vmem>>, vector<1x1x32xf32>
    %111 = vector.shape_cast %110 : vector<1x1x32xf32> to vector<1x32xf32>
    %112 = vector.broadcast %111 : vector<1x32xf32> to vector<12x32xf32>
    %113 = arith.addf %109, %112 : vector<12x32xf32>
    %114 = arith.addf %113, %1 : vector<12x32xf32>
    %c0_46 = arith.constant 0 : index
    %c0_47 = arith.constant 0 : index
    %c0_48 = arith.constant 0 : index
    %115 = vector.load %arg11[%c0_46, %c0_47, %c0_48] : memref<2x1x32xf32, #tpu.memory_space<vmem>>, vector<1x1x32xf32>
    %116 = vector.shape_cast %115 : vector<1x1x32xf32> to vector<1x32xf32>
    %c0_49 = arith.constant 0 : index
    %c0_50 = arith.constant 0 : index
    %c0_51 = arith.constant 0 : index
    %117 = vector.load %arg12[%c0_49, %c0_50, %c0_51] : memref<2x1x32xf32, #tpu.memory_space<vmem>>, vector<1x1x32xf32>
    %118 = vector.shape_cast %117 : vector<1x1x32xf32> to vector<1x32xf32>
    %cst_52 = arith.constant dense<0.000000e+00> : vector<12xf32>
    %119 = vector.multi_reduction <add>, %114, %cst_52 [1] : vector<12x32xf32> to vector<12xf32>
    %120 = vector.shape_cast %119 : vector<12xf32> to vector<12x1xf32>
    %cst_53 = arith.constant 3.200000e+01 : f32
    %121 = vector.broadcast %cst_53 : f32 to vector<12x1xf32>
    %122 = arith.divf %120, %121 : vector<12x1xf32>
    %123 = vector.broadcast %122 : vector<12x1xf32> to vector<12x32xf32>
    %124 = arith.subf %114, %123 : vector<12x32xf32>
    %125 = arith.mulf %124, %124 : vector<12x32xf32>
    %cst_54 = arith.constant dense<0.000000e+00> : vector<12xf32>
    %126 = vector.multi_reduction <add>, %125, %cst_54 [1] : vector<12x32xf32> to vector<12xf32>
    %127 = vector.shape_cast %126 : vector<12xf32> to vector<12x1xf32>
    %cst_55 = arith.constant 3.200000e+01 : f32
    %128 = vector.broadcast %cst_55 : f32 to vector<12x1xf32>
    %129 = arith.divf %127, %128 : vector<12x1xf32>
    %130 = vector.broadcast %122 : vector<12x1xf32> to vector<12x32xf32>
    %131 = arith.subf %114, %130 : vector<12x32xf32>
    %cst_56 = arith.constant 9.99999974E-6 : f32
    %132 = vector.broadcast %cst_56 : f32 to vector<12x1xf32>
    %133 = arith.addf %129, %132 : vector<12x1xf32>
    %134 = math.rsqrt %133 : vector<12x1xf32>
    %135 = vector.broadcast %134 : vector<12x1xf32> to vector<12x32xf32>
    %136 = arith.mulf %131, %135 : vector<12x32xf32>
    %137 = vector.broadcast %116 : vector<1x32xf32> to vector<12x32xf32>
    %138 = arith.mulf %136, %137 : vector<12x32xf32>
    %139 = vector.broadcast %118 : vector<1x32xf32> to vector<12x32xf32>
    %140 = arith.addf %138, %139 : vector<12x32xf32>
    %c0_57 = arith.constant 0 : index
    %c0_58 = arith.constant 0 : index
    %c0_59 = arith.constant 0 : index
    %141 = vector.load %arg7[%c0_57, %c0_58, %c0_59] : memref<2x32x64xf32, #tpu.memory_space<vmem>>, vector<1x32x64xf32>
    %142 = vector.shape_cast %141 : vector<1x32x64xf32> to vector<32x64xf32>
    %cst_60 = arith.constant dense<0.000000e+00> : vector<12x64xf32>
    %143 = tpu.matmul %140, %142, %cst_60 {dimension_numbers = #tpu.dot_dimension_numbers<[1], [0], [0], [1], [0, 0, 1, 1], [], []>} : vector<12x32xf32>, vector<32x64xf32>, vector<12x64xf32> -> vector<12x64xf32>
    %c0_61 = arith.constant 0 : index
    %c0_62 = arith.constant 0 : index
    %c0_63 = arith.constant 0 : index
    %144 = vector.load %arg8[%c0_61, %c0_62, %c0_63] : memref<2x1x64xf32, #tpu.memory_space<vmem>>, vector<1x1x64xf32>
    %145 = vector.shape_cast %144 : vector<1x1x64xf32> to vector<1x64xf32>
    %146 = vector.broadcast %145 : vector<1x64xf32> to vector<12x64xf32>
    %147 = arith.addf %143, %146 : vector<12x64xf32>
    %cst_64 = arith.constant 0.000000e+00 : f32
    %148 = vector.broadcast %cst_64 : f32 to vector<12x64xf32>
    %149 = arith.maximumf %147, %148 : vector<12x64xf32>
    %c0_65 = arith.constant 0 : index
    %c0_66 = arith.constant 0 : index
    %c0_67 = arith.constant 0 : index
    %150 = vector.load %arg9[%c0_65, %c0_66, %c0_67] : memref<2x64x32xf32, #tpu.memory_space<vmem>>, vector<1x64x32xf32>
    %151 = vector.shape_cast %150 : vector<1x64x32xf32> to vector<64x32xf32>
    %cst_68 = arith.constant dense<0.000000e+00> : vector<12x32xf32>
    %152 = tpu.matmul %149, %151, %cst_68 {dimension_numbers = #tpu.dot_dimension_numbers<[1], [0], [0], [1], [0, 0, 1, 1], [], []>} : vector<12x64xf32>, vector<64x32xf32>, vector<12x32xf32> -> vector<12x32xf32>
    %c0_69 = arith.constant 0 : index
    %c0_70 = arith.constant 0 : index
    %c0_71 = arith.constant 0 : index
    %153 = vector.load %arg10[%c0_69, %c0_70, %c0_71] : memref<2x1x32xf32, #tpu.memory_space<vmem>>, vector<1x1x32xf32>
    %154 = vector.shape_cast %153 : vector<1x1x32xf32> to vector<1x32xf32>
    %155 = vector.broadcast %154 : vector<1x32xf32> to vector<12x32xf32>
    %156 = arith.addf %152, %155 : vector<12x32xf32>
    %157 = arith.addf %156, %140 : vector<12x32xf32>
    %c0_72 = arith.constant 0 : index
    %c0_73 = arith.constant 0 : index
    %c0_74 = arith.constant 0 : index
    %158 = vector.load %arg13[%c0_72, %c0_73, %c0_74] : memref<2x1x32xf32, #tpu.memory_space<vmem>>, vector<1x1x32xf32>
    %159 = vector.shape_cast %158 : vector<1x1x32xf32> to vector<1x32xf32>
    %c0_75 = arith.constant 0 : index
    %c0_76 = arith.constant 0 : index
    %c0_77 = arith.constant 0 : index
    %160 = vector.load %arg14[%c0_75, %c0_76, %c0_77] : memref<2x1x32xf32, #tpu.memory_space<vmem>>, vector<1x1x32xf32>
    %161 = vector.shape_cast %160 : vector<1x1x32xf32> to vector<1x32xf32>
    %cst_78 = arith.constant dense<0.000000e+00> : vector<12xf32>
    %162 = vector.multi_reduction <add>, %157, %cst_78 [1] : vector<12x32xf32> to vector<12xf32>
    %163 = vector.shape_cast %162 : vector<12xf32> to vector<12x1xf32>
    %cst_79 = arith.constant 3.200000e+01 : f32
    %164 = vector.broadcast %cst_79 : f32 to vector<12x1xf32>
    %165 = arith.divf %163, %164 : vector<12x1xf32>
    %166 = vector.broadcast %165 : vector<12x1xf32> to vector<12x32xf32>
    %167 = arith.subf %157, %166 : vector<12x32xf32>
    %168 = arith.mulf %167, %167 : vector<12x32xf32>
    %cst_80 = arith.constant dense<0.000000e+00> : vector<12xf32>
    %169 = vector.multi_reduction <add>, %168, %cst_80 [1] : vector<12x32xf32> to vector<12xf32>
    %170 = vector.shape_cast %169 : vector<12xf32> to vector<12x1xf32>
    %cst_81 = arith.constant 3.200000e+01 : f32
    %171 = vector.broadcast %cst_81 : f32 to vector<12x1xf32>
    %172 = arith.divf %170, %171 : vector<12x1xf32>
    %173 = vector.broadcast %165 : vector<12x1xf32> to vector<12x32xf32>
    %174 = arith.subf %157, %173 : vector<12x32xf32>
    %cst_82 = arith.constant 9.99999974E-6 : f32
    %175 = vector.broadcast %cst_82 : f32 to vector<12x1xf32>
    %176 = arith.addf %172, %175 : vector<12x1xf32>
    %177 = math.rsqrt %176 : vector<12x1xf32>
    %178 = vector.broadcast %177 : vector<12x1xf32> to vector<12x32xf32>
    %179 = arith.mulf %174, %178 : vector<12x32xf32>
    %180 = vector.broadcast %159 : vector<1x32xf32> to vector<12x32xf32>
    %181 = arith.mulf %179, %180 : vector<12x32xf32>
    %182 = vector.broadcast %161 : vector<1x32xf32> to vector<12x32xf32>
    %183 = arith.addf %181, %182 : vector<12x32xf32>
    %c1 = arith.constant 1 : index
    %c0_83 = arith.constant 0 : index
    %c0_84 = arith.constant 0 : index
    %184 = vector.load %arg3[%c1, %c0_83, %c0_84] : memref<2x32x96xf32, #tpu.memory_space<vmem>>, vector<1x32x96xf32>
    %185 = vector.shape_cast %184 : vector<1x32x96xf32> to vector<32x96xf32>
    %cst_85 = arith.constant dense<0.000000e+00> : vector<12x96xf32>
    %186 = tpu.matmul %183, %185, %cst_85 {dimension_numbers = #tpu.dot_dimension_numbers<[1], [0], [0], [1], [0, 0, 1, 1], [], []>} : vector<12x32xf32>, vector<32x96xf32>, vector<12x96xf32> -> vector<12x96xf32>
    %c1_86 = arith.constant 1 : index
    %c0_87 = arith.constant 0 : index
    %c0_88 = arith.constant 0 : index
    %187 = vector.load %arg4[%c1_86, %c0_87, %c0_88] : memref<2x1x96xf32, #tpu.memory_space<vmem>>, vector<1x1x96xf32>
    %188 = vector.shape_cast %187 : vector<1x1x96xf32> to vector<1x96xf32>
    %189 = vector.broadcast %188 : vector<1x96xf32> to vector<12x96xf32>
    %190 = arith.addf %186, %189 : vector<12x96xf32>
    %c1_89 = arith.constant 1 : index
    %c0_90 = arith.constant 0 : index
    %c0_91 = arith.constant 0 : index
    %191 = vector.load %arg5[%c1_89, %c0_90, %c0_91] : memref<2x32x32xf32, #tpu.memory_space<vmem>>, vector<1x32x32xf32>
    %192 = vector.shape_cast %191 : vector<1x32x32xf32> to vector<32x32xf32>
    %193 = vector.extract_strided_slice %190 {offsets = [0, 0], sizes = [12, 8], strides = [1, 1]} : vector<12x96xf32> to vector<12x8xf32>
    %194 = vector.extract_strided_slice %190 {offsets = [0, 32], sizes = [12, 8], strides = [1, 1]} : vector<12x96xf32> to vector<12x8xf32>
    %195 = vector.extract_strided_slice %190 {offsets = [0, 64], sizes = [12, 8], strides = [1, 1]} : vector<12x96xf32> to vector<12x8xf32>
    %cst_92 = arith.constant dense<0.000000e+00> : vector<12x12xf32>
    %196 = tpu.matmul %193, %194, %cst_92 {dimension_numbers = #tpu.dot_dimension_numbers<[1], [1], [0], [0], [0, 0, 1, 0], [], []>} : vector<12x8xf32>, vector<12x8xf32>, vector<12x12xf32> -> vector<12x12xf32>
    %cst_93 = arith.constant 0.353553385 : f32
    %197 = vector.broadcast %cst_93 : f32 to vector<12x12xf32>
    %198 = arith.mulf %196, %197 : vector<12x12xf32>
    %cst_94 = arith.constant -1.000000e+30 : f32
    %199 = vector.shape_cast %5 : vector<1x12xi1> to vector<1x12xi1>
    %200 = vector.broadcast %199 : vector<1x12xi1> to vector<12x12xi1>
    %201 = vector.broadcast %cst_94 : f32 to vector<12x12xf32>
    %202 = arith.select %200, %198, %201 : vector<12x12xi1>, vector<12x12xf32>
    %cst_95 = arith.constant dense<0xFF800000> : vector<12xf32>
    %203 = vector.multi_reduction <maximumf>, %202, %cst_95 [1] : vector<12x12xf32> to vector<12xf32>
    %204 = vector.shape_cast %203 : vector<12xf32> to vector<12x1xf32>
    %205 = vector.broadcast %204 : vector<12x1xf32> to vector<12x12xf32>
    %206 = arith.subf %202, %205 : vector<12x12xf32>
    %207 = math.exp %206 : vector<12x12xf32>
    %cst_96 = arith.constant dense<0.000000e+00> : vector<12xf32>
    %208 = vector.multi_reduction <add>, %207, %cst_96 [1] : vector<12x12xf32> to vector<12xf32>
    %209 = vector.shape_cast %208 : vector<12xf32> to vector<12x1xf32>
    %210 = tpu.reciprocal %209 {approx = true} : vector<12x1xf32> -> vector<12x1xf32>
    %211 = vector.broadcast %210 : vector<12x1xf32> to vector<12x12xf32>
    %212 = arith.mulf %207, %211 : vector<12x12xf32>
    %cst_97 = arith.constant dense<0.000000e+00> : vector<12x8xf32>
    %213 = tpu.matmul %212, %195, %cst_97 {dimension_numbers = #tpu.dot_dimension_numbers<[1], [0], [0], [1], [0, 0, 1, 1], [], []>} : vector<12x12xf32>, vector<12x8xf32>, vector<12x8xf32> -> vector<12x8xf32>
    %214 = vector.extract_strided_slice %192 {offsets = [0, 0], sizes = [8, 32], strides = [1, 1]} : vector<32x32xf32> to vector<8x32xf32>
    %cst_98 = arith.constant dense<0.000000e+00> : vector<12x32xf32>
    %215 = tpu.matmul %213, %214, %cst_98 {dimension_numbers = #tpu.dot_dimension_numbers<[1], [0], [0], [1], [0, 0, 1, 1], [], []>} : vector<12x8xf32>, vector<8x32xf32>, vector<12x32xf32> -> vector<12x32xf32>
    %216 = vector.extract_strided_slice %190 {offsets = [0, 8], sizes = [12, 8], strides = [1, 1]} : vector<12x96xf32> to vector<12x8xf32>
    %217 = vector.extract_strided_slice %190 {offsets = [0, 40], sizes = [12, 8], strides = [1, 1]} : vector<12x96xf32> to vector<12x8xf32>
    %218 = vector.extract_strided_slice %190 {offsets = [0, 72], sizes = [12, 8], strides = [1, 1]} : vector<12x96xf32> to vector<12x8xf32>
    %cst_99 = arith.constant dense<0.000000e+00> : vector<12x12xf32>
    %219 = tpu.matmul %216, %217, %cst_99 {dimension_numbers = #tpu.dot_dimension_numbers<[1], [1], [0], [0], [0, 0, 1, 0], [], []>} : vector<12x8xf32>, vector<12x8xf32>, vector<12x12xf32> -> vector<12x12xf32>
    %cst_100 = arith.constant 0.353553385 : f32
    %220 = vector.broadcast %cst_100 : f32 to vector<12x12xf32>
    %221 = arith.mulf %219, %220 : vector<12x12xf32>
    %cst_101 = arith.constant -1.000000e+30 : f32
    %222 = vector.shape_cast %5 : vector<1x12xi1> to vector<1x12xi1>
    %223 = vector.broadcast %222 : vector<1x12xi1> to vector<12x12xi1>
    %224 = vector.broadcast %cst_101 : f32 to vector<12x12xf32>
    %225 = arith.select %223, %221, %224 : vector<12x12xi1>, vector<12x12xf32>
    %cst_102 = arith.constant dense<0xFF800000> : vector<12xf32>
    %226 = vector.multi_reduction <maximumf>, %225, %cst_102 [1] : vector<12x12xf32> to vector<12xf32>
    %227 = vector.shape_cast %226 : vector<12xf32> to vector<12x1xf32>
    %228 = vector.broadcast %227 : vector<12x1xf32> to vector<12x12xf32>
    %229 = arith.subf %225, %228 : vector<12x12xf32>
    %230 = math.exp %229 : vector<12x12xf32>
    %cst_103 = arith.constant dense<0.000000e+00> : vector<12xf32>
    %231 = vector.multi_reduction <add>, %230, %cst_103 [1] : vector<12x12xf32> to vector<12xf32>
    %232 = vector.shape_cast %231 : vector<12xf32> to vector<12x1xf32>
    %233 = tpu.reciprocal %232 {approx = true} : vector<12x1xf32> -> vector<12x1xf32>
    %234 = vector.broadcast %233 : vector<12x1xf32> to vector<12x12xf32>
    %235 = arith.mulf %230, %234 : vector<12x12xf32>
    %cst_104 = arith.constant dense<0.000000e+00> : vector<12x8xf32>
    %236 = tpu.matmul %235, %218, %cst_104 {dimension_numbers = #tpu.dot_dimension_numbers<[1], [0], [0], [1], [0, 0, 1, 1], [], []>} : vector<12x12xf32>, vector<12x8xf32>, vector<12x8xf32> -> vector<12x8xf32>
    %237 = vector.extract_strided_slice %192 {offsets = [8, 0], sizes = [8, 32], strides = [1, 1]} : vector<32x32xf32> to vector<8x32xf32>
    %cst_105 = arith.constant dense<0.000000e+00> : vector<12x32xf32>
    %238 = tpu.matmul %236, %237, %cst_105 {dimension_numbers = #tpu.dot_dimension_numbers<[1], [0], [0], [1], [0, 0, 1, 1], [], []>} : vector<12x8xf32>, vector<8x32xf32>, vector<12x32xf32> -> vector<12x32xf32>
    %239 = arith.addf %215, %238 : vector<12x32xf32>
    %240 = vector.extract_strided_slice %190 {offsets = [0, 16], sizes = [12, 8], strides = [1, 1]} : vector<12x96xf32> to vector<12x8xf32>
    %241 = vector.extract_strided_slice %190 {offsets = [0, 48], sizes = [12, 8], strides = [1, 1]} : vector<12x96xf32> to vector<12x8xf32>
    %242 = vector.extract_strided_slice %190 {offsets = [0, 80], sizes = [12, 8], strides = [1, 1]} : vector<12x96xf32> to vector<12x8xf32>
    %cst_106 = arith.constant dense<0.000000e+00> : vector<12x12xf32>
    %243 = tpu.matmul %240, %241, %cst_106 {dimension_numbers = #tpu.dot_dimension_numbers<[1], [1], [0], [0], [0, 0, 1, 0], [], []>} : vector<12x8xf32>, vector<12x8xf32>, vector<12x12xf32> -> vector<12x12xf32>
    %cst_107 = arith.constant 0.353553385 : f32
    %244 = vector.broadcast %cst_107 : f32 to vector<12x12xf32>
    %245 = arith.mulf %243, %244 : vector<12x12xf32>
    %cst_108 = arith.constant -1.000000e+30 : f32
    %246 = vector.shape_cast %5 : vector<1x12xi1> to vector<1x12xi1>
    %247 = vector.broadcast %246 : vector<1x12xi1> to vector<12x12xi1>
    %248 = vector.broadcast %cst_108 : f32 to vector<12x12xf32>
    %249 = arith.select %247, %245, %248 : vector<12x12xi1>, vector<12x12xf32>
    %cst_109 = arith.constant dense<0xFF800000> : vector<12xf32>
    %250 = vector.multi_reduction <maximumf>, %249, %cst_109 [1] : vector<12x12xf32> to vector<12xf32>
    %251 = vector.shape_cast %250 : vector<12xf32> to vector<12x1xf32>
    %252 = vector.broadcast %251 : vector<12x1xf32> to vector<12x12xf32>
    %253 = arith.subf %249, %252 : vector<12x12xf32>
    %254 = math.exp %253 : vector<12x12xf32>
    %cst_110 = arith.constant dense<0.000000e+00> : vector<12xf32>
    %255 = vector.multi_reduction <add>, %254, %cst_110 [1] : vector<12x12xf32> to vector<12xf32>
    %256 = vector.shape_cast %255 : vector<12xf32> to vector<12x1xf32>
    %257 = tpu.reciprocal %256 {approx = true} : vector<12x1xf32> -> vector<12x1xf32>
    %258 = vector.broadcast %257 : vector<12x1xf32> to vector<12x12xf32>
    %259 = arith.mulf %254, %258 : vector<12x12xf32>
    %cst_111 = arith.constant dense<0.000000e+00> : vector<12x8xf32>
    %260 = tpu.matmul %259, %242, %cst_111 {dimension_numbers = #tpu.dot_dimension_numbers<[1], [0], [0], [1], [0, 0, 1, 1], [], []>} : vector<12x12xf32>, vector<12x8xf32>, vector<12x8xf32> -> vector<12x8xf32>
    %261 = vector.extract_strided_slice %192 {offsets = [16, 0], sizes = [8, 32], strides = [1, 1]} : vector<32x32xf32> to vector<8x32xf32>
    %cst_112 = arith.constant dense<0.000000e+00> : vector<12x32xf32>
    %262 = tpu.matmul %260, %261, %cst_112 {dimension_numbers = #tpu.dot_dimension_numbers<[1], [0], [0], [1], [0, 0, 1, 1], [], []>} : vector<12x8xf32>, vector<8x32xf32>, vector<12x32xf32> -> vector<12x32xf32>
    %263 = arith.addf %239, %262 : vector<12x32xf32>
    %264 = vector.extract_strided_slice %190 {offsets = [0, 24], sizes = [12, 8], strides = [1, 1]} : vector<12x96xf32> to vector<12x8xf32>
    %265 = vector.extract_strided_slice %190 {offsets = [0, 56], sizes = [12, 8], strides = [1, 1]} : vector<12x96xf32> to vector<12x8xf32>
    %266 = vector.extract_strided_slice %190 {offsets = [0, 88], sizes = [12, 8], strides = [1, 1]} : vector<12x96xf32> to vector<12x8xf32>
    %cst_113 = arith.constant dense<0.000000e+00> : vector<12x12xf32>
    %267 = tpu.matmul %264, %265, %cst_113 {dimension_numbers = #tpu.dot_dimension_numbers<[1], [1], [0], [0], [0, 0, 1, 0], [], []>} : vector<12x8xf32>, vector<12x8xf32>, vector<12x12xf32> -> vector<12x12xf32>
    %cst_114 = arith.constant 0.353553385 : f32
    %268 = vector.broadcast %cst_114 : f32 to vector<12x12xf32>
    %269 = arith.mulf %267, %268 : vector<12x12xf32>
    %cst_115 = arith.constant -1.000000e+30 : f32
    %270 = vector.shape_cast %5 : vector<1x12xi1> to vector<1x12xi1>
    %271 = vector.broadcast %270 : vector<1x12xi1> to vector<12x12xi1>
    %272 = vector.broadcast %cst_115 : f32 to vector<12x12xf32>
    %273 = arith.select %271, %269, %272 : vector<12x12xi1>, vector<12x12xf32>
    %cst_116 = arith.constant dense<0xFF800000> : vector<12xf32>
    %274 = vector.multi_reduction <maximumf>, %273, %cst_116 [1] : vector<12x12xf32> to vector<12xf32>
    %275 = vector.shape_cast %274 : vector<12xf32> to vector<12x1xf32>
    %276 = vector.broadcast %275 : vector<12x1xf32> to vector<12x12xf32>
    %277 = arith.subf %273, %276 : vector<12x12xf32>
    %278 = math.exp %277 : vector<12x12xf32>
    %cst_117 = arith.constant dense<0.000000e+00> : vector<12xf32>
    %279 = vector.multi_reduction <add>, %278, %cst_117 [1] : vector<12x12xf32> to vector<12xf32>
    %280 = vector.shape_cast %279 : vector<12xf32> to vector<12x1xf32>
    %281 = tpu.reciprocal %280 {approx = true} : vector<12x1xf32> -> vector<12x1xf32>
    %282 = vector.broadcast %281 : vector<12x1xf32> to vector<12x12xf32>
    %283 = arith.mulf %278, %282 : vector<12x12xf32>
    %cst_118 = arith.constant dense<0.000000e+00> : vector<12x8xf32>
    %284 = tpu.matmul %283, %266, %cst_118 {dimension_numbers = #tpu.dot_dimension_numbers<[1], [0], [0], [1], [0, 0, 1, 1], [], []>} : vector<12x12xf32>, vector<12x8xf32>, vector<12x8xf32> -> vector<12x8xf32>
    %285 = vector.extract_strided_slice %192 {offsets = [24, 0], sizes = [8, 32], strides = [1, 1]} : vector<32x32xf32> to vector<8x32xf32>
    %cst_119 = arith.constant dense<0.000000e+00> : vector<12x32xf32>
    %286 = tpu.matmul %284, %285, %cst_119 {dimension_numbers = #tpu.dot_dimension_numbers<[1], [0], [0], [1], [0, 0, 1, 1], [], []>} : vector<12x8xf32>, vector<8x32xf32>, vector<12x32xf32> -> vector<12x32xf32>
    %287 = arith.addf %263, %286 : vector<12x32xf32>
    %c1_120 = arith.constant 1 : index
    %c0_121 = arith.constant 0 : index
    %c0_122 = arith.constant 0 : index
    %288 = vector.load %arg6[%c1_120, %c0_121, %c0_122] : memref<2x1x32xf32, #tpu.memory_space<vmem>>, vector<1x1x32xf32>
    %289 = vector.shape_cast %288 : vector<1x1x32xf32> to vector<1x32xf32>
    %290 = vector.broadcast %289 : vector<1x32xf32> to vector<12x32xf32>
    %291 = arith.addf %287, %290 : vector<12x32xf32>
    %292 = arith.addf %291, %183 : vector<12x32xf32>
    %c1_123 = arith.constant 1 : index
    %c0_124 = arith.constant 0 : index
    %c0_125 = arith.constant 0 : index
    %293 = vector.load %arg11[%c1_123, %c0_124, %c0_125] : memref<2x1x32xf32, #tpu.memory_space<vmem>>, vector<1x1x32xf32>
    %294 = vector.shape_cast %293 : vector<1x1x32xf32> to vector<1x32xf32>
    %c1_126 = arith.constant 1 : index
    %c0_127 = arith.constant 0 : index
    %c0_128 = arith.constant 0 : index
    %295 = vector.load %arg12[%c1_126, %c0_127, %c0_128] : memref<2x1x32xf32, #tpu.memory_space<vmem>>, vector<1x1x32xf32>
    %296 = vector.shape_cast %295 : vector<1x1x32xf32> to vector<1x32xf32>
    %cst_129 = arith.constant dense<0.000000e+00> : vector<12xf32>
    %297 = vector.multi_reduction <add>, %292, %cst_129 [1] : vector<12x32xf32> to vector<12xf32>
    %298 = vector.shape_cast %297 : vector<12xf32> to vector<12x1xf32>
    %cst_130 = arith.constant 3.200000e+01 : f32
    %299 = vector.broadcast %cst_130 : f32 to vector<12x1xf32>
    %300 = arith.divf %298, %299 : vector<12x1xf32>
    %301 = vector.broadcast %300 : vector<12x1xf32> to vector<12x32xf32>
    %302 = arith.subf %292, %301 : vector<12x32xf32>
    %303 = arith.mulf %302, %302 : vector<12x32xf32>
    %cst_131 = arith.constant dense<0.000000e+00> : vector<12xf32>
    %304 = vector.multi_reduction <add>, %303, %cst_131 [1] : vector<12x32xf32> to vector<12xf32>
    %305 = vector.shape_cast %304 : vector<12xf32> to vector<12x1xf32>
    %cst_132 = arith.constant 3.200000e+01 : f32
    %306 = vector.broadcast %cst_132 : f32 to vector<12x1xf32>
    %307 = arith.divf %305, %306 : vector<12x1xf32>
    %308 = vector.broadcast %300 : vector<12x1xf32> to vector<12x32xf32>
    %309 = arith.subf %292, %308 : vector<12x32xf32>
    %cst_133 = arith.constant 9.99999974E-6 : f32
    %310 = vector.broadcast %cst_133 : f32 to vector<12x1xf32>
    %311 = arith.addf %307, %310 : vector<12x1xf32>
    %312 = math.rsqrt %311 : vector<12x1xf32>
    %313 = vector.broadcast %312 : vector<12x1xf32> to vector<12x32xf32>
    %314 = arith.mulf %309, %313 : vector<12x32xf32>
    %315 = vector.broadcast %294 : vector<1x32xf32> to vector<12x32xf32>
    %316 = arith.mulf %314, %315 : vector<12x32xf32>
    %317 = vector.broadcast %296 : vector<1x32xf32> to vector<12x32xf32>
    %318 = arith.addf %316, %317 : vector<12x32xf32>
    %c1_134 = arith.constant 1 : index
    %c0_135 = arith.constant 0 : index
    %c0_136 = arith.constant 0 : index
    %319 = vector.load %arg7[%c1_134, %c0_135, %c0_136] : memref<2x32x64xf32, #tpu.memory_space<vmem>>, vector<1x32x64xf32>
    %320 = vector.shape_cast %319 : vector<1x32x64xf32> to vector<32x64xf32>
    %cst_137 = arith.constant dense<0.000000e+00> : vector<12x64xf32>
    %321 = tpu.matmul %318, %320, %cst_137 {dimension_numbers = #tpu.dot_dimension_numbers<[1], [0], [0], [1], [0, 0, 1, 1], [], []>} : vector<12x32xf32>, vector<32x64xf32>, vector<12x64xf32> -> vector<12x64xf32>
    %c1_138 = arith.constant 1 : index
    %c0_139 = arith.constant 0 : index
    %c0_140 = arith.constant 0 : index
    %322 = vector.load %arg8[%c1_138, %c0_139, %c0_140] : memref<2x1x64xf32, #tpu.memory_space<vmem>>, vector<1x1x64xf32>
    %323 = vector.shape_cast %322 : vector<1x1x64xf32> to vector<1x64xf32>
    %324 = vector.broadcast %323 : vector<1x64xf32> to vector<12x64xf32>
    %325 = arith.addf %321, %324 : vector<12x64xf32>
    %cst_141 = arith.constant 0.000000e+00 : f32
    %326 = vector.broadcast %cst_141 : f32 to vector<12x64xf32>
    %327 = arith.maximumf %325, %326 : vector<12x64xf32>
    %c1_142 = arith.constant 1 : index
    %c0_143 = arith.constant 0 : index
    %c0_144 = arith.constant 0 : index
    %328 = vector.load %arg9[%c1_142, %c0_143, %c0_144] : memref<2x64x32xf32, #tpu.memory_space<vmem>>, vector<1x64x32xf32>
    %329 = vector.shape_cast %328 : vector<1x64x32xf32> to vector<64x32xf32>
    %cst_145 = arith.constant dense<0.000000e+00> : vector<12x32xf32>
    %330 = tpu.matmul %327, %329, %cst_145 {dimension_numbers = #tpu.dot_dimension_numbers<[1], [0], [0], [1], [0, 0, 1, 1], [], []>} : vector<12x64xf32>, vector<64x32xf32>, vector<12x32xf32> -> vector<12x32xf32>
    %c1_146 = arith.constant 1 : index
    %c0_147 = arith.constant 0 : index
    %c0_148 = arith.constant 0 : index
    %331 = vector.load %arg10[%c1_146, %c0_147, %c0_148] : memref<2x1x32xf32, #tpu.memory_space<vmem>>, vector<1x1x32xf32>
    %332 = vector.shape_cast %331 : vector<1x1x32xf32> to vector<1x32xf32>
    %333 = vector.broadcast %332 : vector<1x32xf32> to vector<12x32xf32>
    %334 = arith.addf %330, %333 : vector<12x32xf32>
    %335 = arith.addf %334, %318 : vector<12x32xf32>
    %c1_149 = arith.constant 1 : index
    %c0_150 = arith.constant 0 : index
    %c0_151 = arith.constant 0 : index
    %336 = vector.load %arg13[%c1_149, %c0_150, %c0_151] : memref<2x1x32xf32, #tpu.memory_space<vmem>>, vector<1x1x32xf32>
    %337 = vector.shape_cast %336 : vector<1x1x32xf32> to vector<1x32xf32>
    %c1_152 = arith.constant 1 : index
    %c0_153 = arith.constant 0 : index
    %c0_154 = arith.constant 0 : index
    %338 = vector.load %arg14[%c1_152, %c0_153, %c0_154] : memref<2x1x32xf32, #tpu.memory_space<vmem>>, vector<1x1x32xf32>
    %339 = vector.shape_cast %338 : vector<1x1x32xf32> to vector<1x32xf32>
    %cst_155 = arith.constant dense<0.000000e+00> : vector<12xf32>
    %340 = vector.multi_reduction <add>, %335, %cst_155 [1] : vector<12x32xf32> to vector<12xf32>
    %341 = vector.shape_cast %340 : vector<12xf32> to vector<12x1xf32>
    %cst_156 = arith.constant 3.200000e+01 : f32
    %342 = vector.broadcast %cst_156 : f32 to vector<12x1xf32>
    %343 = arith.divf %341, %342 : vector<12x1xf32>
    %344 = vector.broadcast %343 : vector<12x1xf32> to vector<12x32xf32>
    %345 = arith.subf %335, %344 : vector<12x32xf32>
    %346 = arith.mulf %345, %345 : vector<12x32xf32>
    %cst_157 = arith.constant dense<0.000000e+00> : vector<12xf32>
    %347 = vector.multi_reduction <add>, %346, %cst_157 [1] : vector<12x32xf32> to vector<12xf32>
    %348 = vector.shape_cast %347 : vector<12xf32> to vector<12x1xf32>
    %cst_158 = arith.constant 3.200000e+01 : f32
    %349 = vector.broadcast %cst_158 : f32 to vector<12x1xf32>
    %350 = arith.divf %348, %349 : vector<12x1xf32>
    %351 = vector.broadcast %343 : vector<12x1xf32> to vector<12x32xf32>
    %352 = arith.subf %335, %351 : vector<12x32xf32>
    %cst_159 = arith.constant 9.99999974E-6 : f32
    %353 = vector.broadcast %cst_159 : f32 to vector<12x1xf32>
    %354 = arith.addf %350, %353 : vector<12x1xf32>
    %355 = math.rsqrt %354 : vector<12x1xf32>
    %356 = vector.broadcast %355 : vector<12x1xf32> to vector<12x32xf32>
    %357 = arith.mulf %352, %356 : vector<12x32xf32>
    %358 = vector.broadcast %337 : vector<1x32xf32> to vector<12x32xf32>
    %359 = arith.mulf %357, %358 : vector<12x32xf32>
    %360 = vector.broadcast %339 : vector<1x32xf32> to vector<12x32xf32>
    %361 = arith.addf %359, %360 : vector<12x32xf32>
    %362 = vector.extract_strided_slice %361 {offsets = [0, 0], sizes = [2, 32], strides = [1, 1]} : vector<12x32xf32> to vector<2x32xf32>
    %363 = vector.extract_strided_slice %361 {offsets = [2, 0], sizes = [2, 32], strides = [1, 1]} : vector<12x32xf32> to vector<2x32xf32>
    %c0_160 = arith.constant 0 : index
    %c0_161 = arith.constant 0 : index
    %364 = vector.load %arg15[%c0_160, %c0_161] : memref<32x16xf32, #tpu.memory_space<vmem>>, vector<32x16xf32>
    %cst_162 = arith.constant dense<0.000000e+00> : vector<2x16xf32>
    %365 = tpu.matmul %362, %364, %cst_162 {dimension_numbers = #tpu.dot_dimension_numbers<[1], [0], [0], [1], [0, 0, 1, 1], [], []>} : vector<2x32xf32>, vector<32x16xf32>, vector<2x16xf32> -> vector<2x16xf32>
    %c0_163 = arith.constant 0 : index
    %c0_164 = arith.constant 0 : index
    %366 = vector.load %arg16[%c0_163, %c0_164] : memref<1x16xf32, #tpu.memory_space<vmem>>, vector<1x16xf32>
    %367 = vector.broadcast %366 : vector<1x16xf32> to vector<2x16xf32>
    %368 = arith.addf %365, %367 : vector<2x16xf32>
    %c0_165 = arith.constant 0 : index
    %c0_166 = arith.constant 0 : index
    %c0_167 = arith.constant 0 : index
    %369 = vector.load %arg19[%c0_165, %c0_166, %c0_167] : memref<1x2x16xf32, #tpu.memory_space<vmem>>, vector<1x2x16xf32>
    %370 = vector.shape_cast %369 : vector<1x2x16xf32> to vector<2x16xf32>
    %371 = vector.shape_cast %368 : vector<2x16xf32> to vector<1x2x16xf32>
    tpu.vector_store %arg19[%c0_165, %c0_166, %c0_167], %371 {strides = array<i32>} : memref<1x2x16xf32, #tpu.memory_space<vmem>>, vector<1x2x16xf32>,
    %c0_168 = arith.constant 0 : index
    %c0_169 = arith.constant 0 : index
    %372 = vector.load %arg17[%c0_168, %c0_169] : memref<32x16xf32, #tpu.memory_space<vmem>>, vector<32x16xf32>
    %cst_170 = arith.constant dense<0.000000e+00> : vector<2x16xf32>
    %373 = tpu.matmul %363, %372, %cst_170 {dimension_numbers = #tpu.dot_dimension_numbers<[1], [0], [0], [1], [0, 0, 1, 1], [], []>} : vector<2x32xf32>, vector<32x16xf32>, vector<2x16xf32> -> vector<2x16xf32>
    %c0_171 = arith.constant 0 : index
    %c0_172 = arith.constant 0 : index
    %374 = vector.load %arg18[%c0_171, %c0_172] : memref<1x16xf32, #tpu.memory_space<vmem>>, vector<1x16xf32>
    %375 = vector.broadcast %374 : vector<1x16xf32> to vector<2x16xf32>
    %376 = arith.addf %373, %375 : vector<2x16xf32>
    %c0_173 = arith.constant 0 : index
    %c0_174 = arith.constant 0 : index
    %c0_175 = arith.constant 0 : index
    %377 = vector.load %arg20[%c0_173, %c0_174, %c0_175] : memref<1x2x16xf32, #tpu.memory_space<vmem>>, vector<1x2x16xf32>
    %378 = vector.shape_cast %377 : vector<1x2x16xf32> to vector<2x16xf32>
    %379 = vector.shape_cast %376 : vector<2x16xf32> to vector<1x2x16xf32>
    tpu.vector_store %arg20[%c0_173, %c0_174, %c0_175], %379 {strides = array<i32>} : memref<1x2x16xf32, #tpu.memory_space<vmem>>, vector<1x2x16xf32>,
    return
  }
  func.func @transform_0(%arg0: i32) -> (i32, i32, i32) {
    %c0_i32 = arith.constant 0 : i32
    %c0_i32_0 = arith.constant 0 : i32
    %c0_i32_1 = arith.constant 0 : i32
    return %arg0, %c0_i32, %c0_i32_0 : i32, i32, i32
  }
  func.func @transform_1(%arg0: i32) -> (i32, i32, i32) {
    %c0_i32 = arith.constant 0 : i32
    %c0_i32_0 = arith.constant 0 : i32
    %c0_i32_1 = arith.constant 0 : i32
    return %arg0, %c0_i32, %c0_i32_0 : i32, i32, i32
  }
  func.func @transform_2(%arg0: i32) -> (i32, i32, i32) {
    %c0_i32 = arith.constant 0 : i32
    %c0_i32_0 = arith.constant 0 : i32
    %c0_i32_1 = arith.constant 0 : i32
    %c0_i32_2 = arith.constant 0 : i32
    return %c0_i32, %c0_i32_0, %c0_i32_1 : i32, i32, i32
  }
  func.func @transform_3(%arg0: i32) -> (i32, i32, i32) {
    %c0_i32 = arith.constant 0 : i32
    %c0_i32_0 = arith.constant 0 : i32
    %c0_i32_1 = arith.constant 0 : i32
    %c0_i32_2 = arith.constant 0 : i32
    return %c0_i32, %c0_i32_0, %c0_i32_1 : i32, i32, i32
  }
  func.func @transform_4(%arg0: i32) -> (i32, i32, i32) {
    %c0_i32 = arith.constant 0 : i32
    %c0_i32_0 = arith.constant 0 : i32
    %c0_i32_1 = arith.constant 0 : i32
    %c0_i32_2 = arith.constant 0 : i32
    return %c0_i32, %c0_i32_0, %c0_i32_1 : i32, i32, i32
  }
  func.func @transform_5(%arg0: i32) -> (i32, i32, i32) {
    %c0_i32 = arith.constant 0 : i32
    %c0_i32_0 = arith.constant 0 : i32
    %c0_i32_1 = arith.constant 0 : i32
    %c0_i32_2 = arith.constant 0 : i32
    return %c0_i32, %c0_i32_0, %c0_i32_1 : i32, i32, i32
  }
  func.func @transform_6(%arg0: i32) -> (i32, i32, i32) {
    %c0_i32 = arith.constant 0 : i32
    %c0_i32_0 = arith.constant 0 : i32
    %c0_i32_1 = arith.constant 0 : i32
    %c0_i32_2 = arith.constant 0 : i32
    return %c0_i32, %c0_i32_0, %c0_i32_1 : i32, i32, i32
  }
  func.func @transform_7(%arg0: i32) -> (i32, i32, i32) {
    %c0_i32 = arith.constant 0 : i32
    %c0_i32_0 = arith.constant 0 : i32
    %c0_i32_1 = arith.constant 0 : i32
    %c0_i32_2 = arith.constant 0 : i32
    return %c0_i32, %c0_i32_0, %c0_i32_1 : i32, i32, i32
  }
  func.func @transform_8(%arg0: i32) -> (i32, i32, i32) {
    %c0_i32 = arith.constant 0 : i32
    %c0_i32_0 = arith.constant 0 : i32
    %c0_i32_1 = arith.constant 0 : i32
    %c0_i32_2 = arith.constant 0 : i32
    return %c0_i32, %c0_i32_0, %c0_i32_1 : i32, i32, i32
  }
  func.func @transform_9(%arg0: i32) -> (i32, i32, i32) {
    %c0_i32 = arith.constant 0 : i32
    %c0_i32_0 = arith.constant 0 : i32
    %c0_i32_1 = arith.constant 0 : i32
    %c0_i32_2 = arith.constant 0 : i32
    return %c0_i32, %c0_i32_0, %c0_i32_1 : i32, i32, i32
  }
  func.func @transform_10(%arg0: i32) -> (i32, i32, i32) {
    %c0_i32 = arith.constant 0 : i32
    %c0_i32_0 = arith.constant 0 : i32
    %c0_i32_1 = arith.constant 0 : i32
    %c0_i32_2 = arith.constant 0 : i32
    return %c0_i32, %c0_i32_0, %c0_i32_1 : i32, i32, i32
  }
  func.func @transform_11(%arg0: i32) -> (i32, i32, i32) {
    %c0_i32 = arith.constant 0 : i32
    %c0_i32_0 = arith.constant 0 : i32
    %c0_i32_1 = arith.constant 0 : i32
    %c0_i32_2 = arith.constant 0 : i32
    return %c0_i32, %c0_i32_0, %c0_i32_1 : i32, i32, i32
  }
  func.func @transform_12(%arg0: i32) -> (i32, i32, i32) {
    %c0_i32 = arith.constant 0 : i32
    %c0_i32_0 = arith.constant 0 : i32
    %c0_i32_1 = arith.constant 0 : i32
    %c0_i32_2 = arith.constant 0 : i32
    return %c0_i32, %c0_i32_0, %c0_i32_1 : i32, i32, i32
  }
  func.func @transform_13(%arg0: i32) -> (i32, i32, i32) {
    %c0_i32 = arith.constant 0 : i32
    %c0_i32_0 = arith.constant 0 : i32
    %c0_i32_1 = arith.constant 0 : i32
    %c0_i32_2 = arith.constant 0 : i32
    return %c0_i32, %c0_i32_0, %c0_i32_1 : i32, i32, i32
  }
  func.func @transform_14(%arg0: i32) -> (i32, i32) {
    %c0_i32 = arith.constant 0 : i32
    %c0_i32_0 = arith.constant 0 : i32
    %c0_i32_1 = arith.constant 0 : i32
    return %c0_i32, %c0_i32_0 : i32, i32
  }
  func.func @transform_15(%arg0: i32) -> (i32, i32) {
    %c0_i32 = arith.constant 0 : i32
    %c0_i32_0 = arith.constant 0 : i32
    %c0_i32_1 = arith.constant 0 : i32
    return %c0_i32, %c0_i32_0 : i32, i32
  }
  func.func @transform_16(%arg0: i32) -> (i32, i32) {
    %c0_i32 = arith.constant 0 : i32
    %c0_i32_0 = arith.constant 0 : i32
    %c0_i32_1 = arith.constant 0 : i32
    return %c0_i32, %c0_i32_0 : i32, i32
  }
  func.func @transform_17(%arg0: i32) -> (i32, i32) {
    %c0_i32 = arith.constant 0 : i32
    %c0_i32_0 = arith.constant 0 : i32
    %c0_i32_1 = arith.constant 0 : i32
    return %c0_i32, %c0_i32_0 : i32, i32
  }
  func.func @transform_18(%arg0: i32) -> (i32, i32, i32) {
    %c0_i32 = arith.constant 0 : i32
    %c0_i32_0 = arith.constant 0 : i32
    %c0_i32_1 = arith.constant 0 : i32
    return %arg0, %c0_i32, %c0_i32_0 : i32, i32, i32
  }
  func.func @transform_19(%arg0: i32) -> (i32, i32, i32) {
    %c0_i32 = arith.constant 0 : i32
    %c0_i32_0 = arith.constant 0 : i32
    %c0_i32_1 = arith.constant 0 : i32
    return %arg0, %c0_i32, %c0_i32_0 : i32, i32, i32
  }
}

</mosaic_0001>

<bundles_post_ra>
// kernel: tpu_custom_call.1
= control target key start
LH: loop header
LB: loop body
LE: loop exit
PB: predicated region body
PF: predicated region fallthrough
CT: control target
= control target key end

     0   :  { %s5836_s0 = inlined_call_operand.vmem [shape: f32[2,12,32], index: 0, kind: input, shape index: {}]   ;;  %s5837_s1 = inlined_call_operand.vmem [shape: f32[2,1,12], index: 1, kind: input, shape index: {}]   ;;  %s5838_s2 = inlined_call_operand.vmem [shape: f32[2,32,96], index: 2, kind: input, shape index: {}]   ;;  %s5839_s3 = inlined_call_operand.vmem [shape: f32[2,1,96], index: 3, kind: input, shape index: {}]   ;;  %s5840_s4 = inlined_call_operand.vmem [shape: f32[2,32,32], index: 4, kind: input, shape index: {}]   ;;  %s5841_s5 = inlined_call_operand.vmem [shape: f32[2,1,32], index: 5, kind: input, shape index: {}]   ;;  %s5842_s6 = inlined_call_operand.vmem [shape: f32[2,32,64], index: 6, kind: input, shape index: {}]   ;;  %s5843_s7 = inlined_call_operand.vmem [shape: f32[2,1,64], index: 7, kind: input, shape index: {}]   ;;  %s5844_s8 = inlined_call_operand.vmem [shape: f32[2,64,32], index: 8, kind: input, shape index: {}]   ;;  %s5845_s9 = inlined_call_operand.vmem [shape: f32[2,1,32], index: 9, kind: input, shape index: {}]   ;;  %s5846_s10 = inlined_call_operand.vmem [shape: f32[2,1,32], index: 10, kind: input, shape index: {}]   ;;  %s5847_s11 = inlined_call_operand.vmem [shape: f32[2,1,32], index: 11, kind: input, shape index: {}]   ;;  %s5848_s12 = inlined_call_operand.vmem [shape: f32[2,1,32], index: 12, kind: input, shape index: {}]   ;;  %s5849_s13 = inlined_call_operand.vmem [shape: f32[2,1,32], index: 13, kind: input, shape index: {}]   ;;  %s5850_s14 = inlined_call_operand.vmem [shape: f32[32,16], index: 14, kind: input, shape index: {}]   ;;  %s5851_s15 = inlined_call_operand.vmem [shape: f32[1,16], index: 15, kind: input, shape index: {}]   ;;  %s5852_s16 = inlined_call_operand.vmem [shape: f32[32,16], index: 16, kind: input, shape index: {}]   ;;  %s5853_s17 = inlined_call_operand.vmem [shape: f32[1,16], index: 17, kind: input, shape index: {}]   ;;  %s5854_s18 = inlined_call_operand.hbm [shape: f32[2,2,16], index: 18, kind: output, shape index: {0}]   ;;  %s5855_s19 = inlined_call_operand.hbm [shape: f32[2,2,16], index: 19, kind: output, shape index: {1}]  }
   0x1   :  { %5880 = sst [smem:[#allocation14_spill]] %s5836_s0 }
   0x2   :  { %5881 = sst [smem:[#allocation15_spill]] %s5837_s1 }
   0x3   :  { %5882 = sst [smem:[#allocation16_spill]] %s5838_s2 }
   0x4   :  { %5883 = sst [smem:[#allocation17_spill]] %s5839_s3 }
   0x5   :  { %5884 = sst [smem:[#allocation18_spill]] %s5840_s4 }
   0x6   :  { %5885 = sst [smem:[#allocation19_spill]] %s5841_s5 }
   0x7   :  { %5886 = sst [smem:[#allocation20_spill]] %s5842_s6 }
   0x8   :  { %25 = vsyncpa [#allocation3], 0 }
   0x9   :  { %27 = vsyncpa [#allocation3 + $0x1], 0 }
   0xa   :  { %28 = vsyncpa [#allocation5], 0 }
   0xb   :  { %30 = vsyncpa [#allocation5 + $0x1], 0  ;;  %s5169_s0 = smov 0   ;;  %s5171_s30 = smov 0  }
   0xc   :  { %s5173_s20 = smov 0   ;;  %s5175_s21 = smov 0  }
   0xd LB: > { %5887 = sst [smem:[#allocation8_spill]] %s5037_s0  ;;  %s5190_s1 = sadd.s32 4294967295, %s5049_s21   ;;  %s5049_s21 = sphi %s5175_s21, %s5922_s21   ;;  %s5045_s20 = sphi %s5173_s20, %s5924_s20   ;;  %s5041_s30 = sphi %s5171_s30, %s5926_s30   ;;  %s5037_s0 = sphi %s5169_s0, %s5925_s0  }
   0xe   : > { %5888 = sst [smem:[#allocation9_spill]] %s5045_s20  ;;  %s4008_s22 = sadd.s32 4294967294, %s5049_s21  }
   0xf   : > { %5889 = sst [smem:[#allocation10_spill]] %s5049_s21  ;;  %s5194_s2 = sadd.s32 1, %s5049_s21  }
  0x10   : > { %5890 = sst [smem:[#allocation11_spill]] %s5194_s2  ;;  %s431_s23 = sadd.s32 1, %s5045_s20 }
  0x11   : > { %s428_s24 = ssub.s32 %s5049_s21, %s5194_s2  ;;  %p441_p0 = scmp.ne.s32.totalorder %s5045_s20, %s5041_s30 }
  0x12   : > { %p429_p1 = scmp.eq.s32.totalorder %s428_s24, 0  ;;  %p442_p2 = scmp.eq.s32.totalorder %s5190_s1, 1 }
  0x13   : > { %p447_p3 = scmp.ne.s32.totalorder %s5041_s30, %s5037_s0  ;;  %p448_p4 = scmp.eq.s32.totalorder %s4008_s22, 1 }
  0x14   : > { %s5205_s25 = scalar_select %p429_p1, %s5045_s20, %s431_s23  }
  0x15   : > { %p5207_p5 = por %p442_p2, %p441_p0  ;;  %p5211_p6 = por %p448_p4, %p447_p3 }
  0x16   : > { %5891 = sst [smem:[#allocation12_spill]] %s5205_s25  ;;  %p4011_p7 = scmp.ge.s32.totalorder %s5049_s21, 1 }
  0x17   : > { %s5893_s26 = scalar_select %p5211_p6, 1, 0 }
  0x18   : > { %p554_p8 = scmp.lt.s32.totalorder %s5049_s21, 3 }
  0x19   : > { %5894 = sst [smem:[#allocation13_spill]] %s5893_s26 }
  0x1a   : > { %p555_p9 = pnand %p4011_p7, %p554_p8 }
  0x1b   : > { %s5895_s29 = sld [smem:[#allocation16_spill]] (!%p555_p9)  ;;  %p618_p10 = scmp.lt.s32.totalorder (!%p555_p9), %s5190_s1, 1  ;;  %vm641_vm0 = vcmask (!%p555_p9), 261120   ;;  %vm733_vm1 = vcmask (!%p555_p9), 64512   ;;  %v820_v31 = vlaneseq (!%p555_p9)  ;;  %v5056_v35 = vmov (!%p555_p9), 0  }
  0x1c   : > { %558 = sbr.rel (%p555_p9) target bundleno = 6145 (0x1801), region = 92  ;;  %s5896_s23 = sld [smem:[#allocation14_spill]] (!%p555_p9)  ;;  %vm5274_vm2 = vmpackc.low (!%p555_p9), %vm733_vm1, %vm733_vm1  ;;  %vm831_vm5 = vcmask (!%p555_p9), 93184   ;;  %vm827_vm6 = vcmask (!%p555_p9), 97280   ;;  %vm862_vm7 = vcmask (!%p555_p9), 1043456   ;;  %vm5063_vm8 = vmmov (!%p555_p9), 1  }
  0x1d   : > { %s5897_s24 = sld [smem:[#allocation17_spill]] (!%p555_p9)  ;;  %s5874_s28 = smov (!%p555_p9), 96   ;;  %v821_v33 = vshrl.u32 (!%p555_p9), %v820_v31, 7  ;;  %vm5346_vm9 = vmpackc.low (!%p555_p9), %vm862_vm7, %vm5063_vm8  ;;  %vm1899_vm10 = vcmask (!%p555_p9), 257024   ;;  %vm2049_vm11 = vcmask (!%p555_p9), 523264   ;;  %vm5065_vm12 = vmmov (!%p555_p9), 0  }
  0x1e   : > { %s5875_s22 = smov (!%p555_p9), 88   ;;  %s5869_s20 = smov (!%p555_p9), 104   ;;  %vm3789_vm13 = vcmask (!%p555_p9), 123904  }
  0x1f   : > { %v822_v34 = vsub.s32 (!%p555_p9), 0, %v821_v33  ;;  %s5868_s2 = smov (!%p555_p9), 48   ;;  %s5903_s4 = sld [smem:[#allocation18_spill]] (!%p555_p9) }
  0x20   : > { %s5904_s5 = sld [smem:[#allocation19_spill]] (!%p555_p9)  ;;  %s5905_s6 = sld [smem:[#allocation20_spill]] (!%p555_p9) }
  0x21   : > { %v630_v0 = vld [vmem:[%s5895_s29] sm:$0xff] (!%p555_p9)  ;;  %v631_v1 = vld [vmem:[%s5895_s29 + $0x8] sm:$0xff] (!%p555_p9)  ;;  %v632_v2 = vld [vmem:[%s5895_s29 + $0x10] sm:$0xff] (!%p555_p9)  ;;  %s5910_s0 = smov (!%p555_p9), 112   ;;  %s5911_s21 = smov (!%p555_p9), 64  }
  0x22   : > { %v4553_v3 = vpack.c.bf16 (!%p555_p9), %v631_v1, %v630_v0  ;;  %v633_v4 = vld [vmem:[%s5895_s29 + $0x18] sm:$0xff] (!%p555_p9) }
  0x23   : > { %v4557_v5 = vpack.c.bf16 %v633_v4, %v632_v2  ;;  %s5231_s26 = scalar_select %p618_p10, %s5190_s1, 1  ;;  %v4016_v8 = vld [vmem:[%s5897_s24] ss:$0 sm:$0xff] }
  0x24   : > { %4554 = vmatprep.subr.bf16.mxu0 %v4553_v3 }
  0x25   : > { %4556 = vmatpush3.bf16.msra.mxu0 %v4553_v3  ;;  %s4154_s27 = sshll.u32 %s5231_s26, 4 }
  0x26   : > { %4558 = vmatprep.subr.bf16.mxu0 %v4557_v5  ;;  %s622_s25 = scalar_lea.vmem %s5896_s23, %s4154_s27  ;;  %s5864_s27 = smov 120  }
  0x27   : > { %v5237_v6 = vld [vmem:[%s622_s25] sm:$0xff]  ;;  %v5241_v7 = vld [vmem:[%s622_s25 + $0x8] sm:$0xf]  ;;  %s5862_s23 = smov 112   ;;  %s5873_s25 = smov 80  }
  0x28   : > { %4305 = vmatprep.mubr.msk.f32.mxu0 %vm641_vm0, %v5237_v6 }
  0x29   : > { %4560 = vmatpush3.bf16.msra.mxu0 %v4557_v5 }
  0x2c   : > { %4306 = vmatmul.mubr.msk.f32.vlgmr.msra.gmra.mrb[0].mxu0 %vm641_vm0, %v5241_v7 }
  0xff   : > { %v4307_v9 = vpop.f32.mrb[0].mxu0 }
 0x100   : > { %v5248_v10 = vadd.f32 %v4307_v9, %v4016_v8  ;;  %v714_v11 = vpop.f32.mrb[1].mxu0 }
 0x101   : > { %v5250_v12 = vadd.f32 %v4016_v8, %v714_v11 }
 0x103   : > { %940 = vrot.lane.b32.xlu1 %v5250_v12, %s5864_s27  ;;  %4312 = vmatprep.mubr.msk.f32.mxu1 %vm733_vm1, %v5250_v12  ;;  %v5258_v13 = vpack.i.bf16 %v5248_v10, %v5250_v12 }
 0x105   : > { %4798 = vrot.lane.b32.xlu0 %v5258_v13, %s5874_s28  ;;  %s5915_s28 = smov 48  }
 0x107   : > { %942 = vrot.lane.b32.xlu1 %v5248_v10, %s5864_s27 }
 0x109   : > { %4803 = vrot.lane.b32.xlu0 %v5258_v13, %s5875_s22  ;;  %s5906_s22 = smov 88  }
 0x10b   : > { %1307 = vrot.lane.b32.xlu1 %v5250_v12, %s5862_s23 }
 0x10d   : > { %4808 = vrot.lane.b32.xlu0 %v5258_v13, %s5873_s25  ;;  %s5914_s25 = smov 56  }
 0x111   : > { %1309 = vrot.lane.b32.xlu0 %v5248_v10, %s5862_s23  ;;  %s5900_s23 = sld [smem:[#allocation15_spill]] }
 0x117   : > { %s625_s27 = scalar_lea.vmem %s5900_s23, %s5231_s26  ;;  %s5866_s26 = smov 56  }
 0x118   : > { %v628_v32 = vld [vmem:[%s625_s27] sm:$0x1]  ;;  %s5871_s27 = smov 72   ;;  %s5872_s23 = smov 64  }
 0x119   : > { %vm629_vm3 = vcmp.gt.f32.partialorder %v628_v32, 0.5 }
 0x11a   : > { %v819_v36 = vsel %vm629_vm3, 1, %v5056_v35 }
 0x11b   : > { %v5300_v37 = vrot.slane %v819_v36, %v822_v34 }
 0x11d   : > { %vm824_vm4 = vcmp.eq.s32.totalorder %v5300_v37, 1 }
 0x175   : > { %v941_v24 = vpop.permute.xlu1 %940 }
 0x177   : > { %v4799_v14 = vpop.permute.xlu0 %4798 }
 0x178   : > { %v4801_v15 = vunpack.i.h.bf16 %v4799_v14  ;;  %v4800_v16 = vunpack.i.l.bf16 %v4799_v14 }
 0x179   : > { %v943_v28 = vpop.permute.xlu1 %942 }
 0x17a   : > { %v4561_v18 = vpack.c.bf16 %v4801_v15, %v4800_v16 }
 0x17b   : > { %v4804_v19 = vpop.permute.xlu0 %4803 }
 0x17c   : > { %v4806_v20 = vunpack.i.h.bf16 %v4804_v19  ;;  %v4805_v21 = vunpack.i.l.bf16 %v4804_v19  ;;  %4563 = vmatprep.subr.msk.bf16.mxu1 %vm5274_vm2, %v4561_v18 }
 0x17d   : > { %4566 = vmatpush3.bf16.xpose.msk.msra.mxu1 %vm5274_vm2, %v4561_v18  ;;  %v1308_v29 = vpop.permute.xlu1 %1307 }
 0x17e   : > { %v4573_v22 = vpack.c.bf16 %v4806_v20, %v4805_v21 }
 0x17f   : > { %v4809_v23 = vpop.permute.xlu0 %4808 }
 0x180   : > { %v4811_v25 = vunpack.i.h.bf16 %v4809_v23  ;;  %v4810_v26 = vunpack.i.l.bf16 %v4809_v23  ;;  %4575 = vmatprep.subr.msk.bf16.mxu1 %vm5274_vm2, %v4573_v22 }
 0x182   : > { %v4585_v27 = vpack.c.bf16 %v4811_v25, %v4810_v26 }
 0x183   : > { %v1310_v30 = vpop.permute.xlu0 %1309 }
 0x184   : > { %4313 = vmatmul.mubr.msk.f32.vlgmr.msra.gmra.mrb[0].mxu1 %vm733_vm1, %v5248_v10 }
 0x185   : > { %4578 = vmatpush3.bf16.xpose.msk.msra.mxu1 %vm5274_vm2, %v4573_v22  ;;  %4326 = vmatprep.mubr.msk.f32.mxu1 %vm733_vm1, %v941_v24 }
 0x186   : > { %4587 = vmatprep.subr.msk.bf16.mxu1 %vm5274_vm2, %v4585_v27 }
 0x18c   : > { %4327 = vmatmul.mubr.msk.f32.vlgmr.msra.gmra.mrb[2].mxu1 %vm733_vm1, %v943_v28 }
 0x18d   : > { %4590 = vmatpush3.bf16.xpose.msk.msra.mxu1 %vm5274_vm2, %v4585_v27  ;;  %4350 = vmatprep.mubr.msk.f32.mxu1 %vm733_vm1, %v1308_v29 }
 0x194   : > { %4351 = vmatmul.mubr.msk.f32.vlgmr.msra.gmra.mrb[4].mxu1 %vm733_vm1, %v1310_v30 }
 0x257   : > { %v4314_v38 = vpop.f32.mrb[0].mxu1 }
 0x258   : > { %v818_v39 = vmul.f32 0.35355338, %v4314_v38  ;;  %v808_v40 = vpop.f32.mrb[1].mxu1 }
 0x259   : > { %v817_v41 = vmul.f32 0.35355338, %v808_v40 }
 0x25a   : > { %v826_v42 = vsel %vm824_vm4, %v818_v39, -1e+30 }
 0x25b   : > { %v832_v43 = vsel %vm831_vm5, %v826_v42, -inf  ;;  %v825_v44 = vsel %vm824_vm4, %v817_v41, -1e+30 }
 0x25c   : > { %833 = vmax.xlane.f32.xlu0 %v832_v43  ;;  %v828_v45 = vsel %vm827_vm6, %v825_v44, -inf }
 0x25d   : > { %829 = vmax.xlane.f32.xlu1 %v828_v45 }
 0x25f   : > { %v4328_v46 = vpop.f32.mrb[2].mxu1 }
 0x260   : > { %v1032_v47 = vmul.f32 0.35355338, %v4328_v46  ;;  %v1022_v48 = vpop.f32.mrb[3].mxu1 }
 0x261   : > { %v1031_v49 = vmul.f32 0.35355338, %v1022_v48 }
 0x262   : > { %v1034_v50 = vsel %vm824_vm4, %v1032_v47, -1e+30 }
 0x263   : > { %v1038_v51 = vsel %vm831_vm5, %v1034_v50, -inf  ;;  %v1033_v52 = vsel %vm824_vm4, %v1031_v49, -1e+30 }
 0x264   : > { %1039 = vmax.xlane.f32.xlu1 %v1038_v51  ;;  %v1035_v53 = vsel %vm827_vm6, %v1033_v52, -inf }
 0x265   : > { %1036 = vmax.xlane.f32.xlu0 %v1035_v53 }
 0x267   : > { %v4352_v54 = vpop.f32.mrb[4].mxu1 }
 0x268   : > { %v1389_v55 = vpop.f32.mrb[5].mxu1  ;;  %v1399_v19 = vmul.f32 0.35355338, %v4352_v54 }
 0x269   : > { %v1398_v18 = vmul.f32 0.35355338, %v1389_v55 }
 0x26a   : > { %v1401_v22 = vsel %vm824_vm4, %v1399_v19, -1e+30 }
 0x26b   : > { %v1400_v20 = vsel %vm824_vm4, %v1398_v18, -1e+30  ;;  %v1405_v23 = vsel %vm831_vm5, %v1401_v22, -inf }
 0x26c   : > { %v1402_v21 = vsel %vm827_vm6, %v1400_v20, -inf }
 0x2e9   : > { %v834_v56 = vpop.xlane.xlu0 %833 }
 0x2ea   : > { %v836_v57 = vsub.f32 %v826_v42, %v834_v56  ;;  %v830_v58 = vpop.xlane.xlu1 %829 }
 0x2eb   : > { %v835_v59 = vsub.f32 %v825_v44, %v830_v58 }
 0x2ec   : > { %v839_v60 = vmul.f32 1.442695, %v836_v57 }
 0x2ed   : > { %v837_v61 = vmul.f32 1.442695, %v835_v59  ;;  %v724_v59 = vld [vmem:[%s5903_s4 + $0x8] sm:$0xff] }
 0x2ee   : > { %4877 = vpow2.f32 %v839_v60  ;;  %v723_v60 = vld [vmem:[%s5903_s4] sm:$0xff] }
 0x2ef   : > { %4879 = vpow2.f32 %v837_v61 }
 0x2f1   : > { %v1040_v62 = vpop.xlane.xlu1 %1039 }
 0x2f2   : > { %v1042_v63 = vsub.f32 %v1034_v50, %v1040_v62  ;;  %v1037_v0 = vpop.xlane.xlu0 %1036 }
 0x2f3   : > { %v1041_v1 = vsub.f32 %v1033_v52, %v1037_v0 }
 0x2f4   : > { %v1045_v2 = vmul.f32 1.442695, %v1042_v63 }
 0x2f5   : > { %v1043_v3 = vmul.f32 1.442695, %v1041_v1 }
 0x2f6   : > { %4881 = vpow2.f32 %v1045_v2 }
 0x2f7   : > { %4883 = vpow2.f32 %v1043_v3 }
 0x2f8   : > { %v5315_v4 = vpop.eup %4877 }
 0x2f9   : > { %v4880_v5 = vpop.eup %4879  ;;  %v844_v8 = vsel %vm831_vm5, %v5315_v4, 0.0 }
 0x2fa   : > { %845 = vadd.xlane.f32.xlu1 %v844_v8  ;;  %v841_v9 = vsel %vm827_vm6, %v4880_v5, 0.0 }
 0x2fb   : > { %842 = vadd.xlane.f32.xlu0 %v841_v9 }
 0x300   : > { %v5320_v11 = vpop.eup %4881 }
 0x301   : > { %v4884_v14 = vpop.eup %4883  ;;  %v1050_v15 = vsel %vm831_vm5, %v5320_v11, 0.0 }
 0x302   : > { %1051 = vadd.xlane.f32.xlu1 %v1050_v15  ;;  %v1047_v16 = vsel %vm827_vm6, %v4884_v14, 0.0 }
 0x303   : > { %1048 = vadd.xlane.f32.xlu0 %v1047_v16 }
 0x313   : > { %4818 = vrot.lane.b32.xlu1 %v5258_v13, %s5866_s26  ;;  %s5867_s26 = smov 40  }
 0x317   : > { %4823 = vrot.lane.b32.xlu1 %v5258_v13, %s5871_s27  ;;  %s5913_s27 = smov 104  }
 0x319   : > { %4813 = vrot.lane.b32.xlu0 %v5258_v13, %s5872_s23  ;;  %s5907_s23 = smov 96  }
 0x31b   : > { %1597 = vrot.lane.b32.xlu1 %v5248_v10, %s5869_s20 }
 0x31d   : > { %1595 = vrot.lane.b32.xlu0 %v5250_v12, %s5869_s20  ;;  %s5908_s20 = smov 80  }
 0x33c   : > { %1403 = vmax.xlane.f32.xlu0 %v1402_v21 }
 0x33f   : > { %1406 = vmax.xlane.f32.xlu1 %v1405_v23 }
 0x350   : > { %4828 = vrot.lane.b32.xlu1 %v5258_v13, %s5868_s2  ;;  %s5909_s2 = smov 120  }
 0x354   : > { %4833 = vrot.lane.b32.xlu1 %v5258_v13, %s5867_s26  ;;  %s5912_s26 = smov 72   ;;  %v4115_v13 = vld [vmem:[%s5904_s5 + $0x1] ss:$0 sm:$0xff] }
 0x387   : > { %v846_v12 = vpop.xlane.xlu1 %845 }
 0x388   : > { %v843_v10 = vpop.xlane.xlu0 %842 }
 0x389   : > { %4885 = vrcp.f32 %v843_v10  ;;  %v725_v10 = vld [vmem:[%s5903_s4 + $0x10] sm:$0xff] }
 0x38a   : > { %4887 = vrcp.f32 %v846_v12 }
 0x38f   : > { %v1052_v24 = vpop.xlane.xlu1 %1051 }
 0x390   : > { %v1049_v25 = vpop.xlane.xlu0 %1048 }
 0x391   : > { %4889 = vrcp.f32 %v1049_v25 }
 0x392   : > { %4891 = vrcp.f32 %v1052_v24 }
 0x393   : > { %v4886_v26 = vpop.eup %4885  ;;  %v4819_v27 = vpop.permute.xlu1 %4818 }
 0x394   : > { %v4814_v28 = vpop.permute.xlu0 %4813  ;;  %v849_v29 = vmul.f32 %v4886_v26, %v4880_v5  ;;  %v4821_v30 = vunpack.i.h.bf16 %v4819_v27  ;;  %v4820_v31 = vunpack.i.l.bf16 %v4819_v27  ;;  %v4888_v36 = vpop.eup %4887 }
 0x395   : > { %v4816_v32 = vunpack.i.h.bf16 %v4814_v28  ;;  %v4815_v33 = vunpack.i.l.bf16 %v4814_v28  ;;  %v850_v44 = vmul.f32 %v4888_v36, %v5315_v4 }
 0x396   : > { %4319 = vmatprep.mubr.msk.f32.mxu0 %vm827_vm6, %v849_v29  ;;  %v4579_v41 = vpack.c.bf16 %v4821_v30, %v4820_v31 }
 0x397   : > { %v4567_v34 = vpack.c.bf16 %v4816_v32, %v4815_v33  ;;  %v4824_v35 = vpop.permute.xlu1 %4823 }
 0x398   : > { %v4826_v38 = vunpack.i.h.bf16 %v4824_v35  ;;  %v4825_v39 = vunpack.i.l.bf16 %v4824_v35  ;;  %v1596_v40 = vpop.permute.xlu0 %1595 }
 0x399   : > { %4569 = vmatprep.subr.msk.bf16.mxu0 %vm5346_vm9, %v4567_v34  ;;  %4369 = vmatprep.mubr.msk.f32.mxu1 %vm733_vm1, %v1596_v40 }
 0x39a   : > { %v4597_v42 = vpack.c.bf16 %v4826_v38, %v4825_v39  ;;  %4572 = vmatpush3.bf16.msk.msra.mxu0 %vm5346_vm9, %v4567_v34 }
 0x39b   : > { %v4890_v43 = vpop.eup %4889  ;;  %4581 = vmatprep.subr.msk.bf16.mxu0 %vm5346_vm9, %v4579_v41  ;;  %v1598_v48 = vpop.permute.xlu1 %1597 }
 0x39c   : > { %v4892_v45 = vpop.eup %4891  ;;  %4599 = vmatprep.subr.msk.bf16.mxu1 %vm5274_vm2, %v4597_v42  ;;  %v1055_v46 = vmul.f32 %v4890_v43, %v4884_v14 }
 0x39d   : > { %4320 = vmatmul.mubr.msk.f32.vlgmr.msra.gmra.mrb[2].mxu0 %vm827_vm6, %v850_v44  ;;  %4602 = vmatpush3.bf16.xpose.msk.msra.mxu1 %vm5274_vm2, %v4597_v42  ;;  %v1056_v47 = vmul.f32 %v4892_v45, %v5320_v11 }
 0x39e   : > { %4584 = vmatpush3.bf16.msk.msra.mxu0 %vm5346_vm9, %v4579_v41  ;;  %4333 = vmatprep.mubr.msk.f32.mxu0 %vm827_vm6, %v1055_v46  ;;  %v726_v41 = vld [vmem:[%s5903_s4 + $0x18] sm:$0xff] }
 0x39f   : > { %4336 = vmatprep.subr.mxu0 %v724_v59 }
 0x3a1   : > { %4334 = vmatmul.mubr.msk.f32.vlgmr.msra.gmra.mrb[4].mxu0 %vm827_vm6, %v1056_v47 }
 0x3a2   : > { %4337 = vmatpush3.msra.mxu0 %v724_v59 }
 0x3a3   : > { %4341 = vmatprep.subr.mxu0 %v723_v60 }
 0x3a4   : > { %4370 = vmatmul.mubr.msk.f32.vlgmr.msra.gmra.mrb[6].mxu1 %vm733_vm1, %v1598_v48 }
 0x3c9   : > { %v1404_v49 = vpop.xlane.xlu0 %1403 }
 0x3ca   : > { %v1408_v50 = vsub.f32 %v1400_v20, %v1404_v49 }
 0x3cc   : > { %v1410_v51 = vmul.f32 1.442695, %v1408_v50  ;;  %v1407_v52 = vpop.xlane.xlu1 %1406  ;;  %v4055_v50 = vld [vmem:[%s5904_s5] ss:$0 sm:$0xff] }
 0x3cd   : > { %v1409_v53 = vsub.f32 %v1401_v22, %v1407_v52 }
 0x3ce   : > { %4893 = vpow2.f32 %v1410_v51 }
 0x3cf   : > { %v1412_v54 = vmul.f32 1.442695, %v1409_v53 }
 0x3d0   : > { %v4829_v62 = vpop.permute.xlu1 %4828 }
 0x3d1   : > { %4895 = vpow2.f32 %v1412_v54  ;;  %v4831_v2 = vunpack.i.h.bf16 %v4829_v62  ;;  %v4830_v3 = vunpack.i.l.bf16 %v4829_v62 }
 0x3d3   : > { %v4591_v8 = vpack.c.bf16 %v4831_v2, %v4830_v3 }
 0x3d4   : > { %v4834_v19 = vpop.permute.xlu1 %4833 }
 0x3d5   : > { %v4836_v12 = vunpack.i.h.bf16 %v4834_v19  ;;  %v4835_v24 = vunpack.i.l.bf16 %v4834_v19  ;;  %v2037_v19 = vld [vmem:[%s5844_s8 + $0x18] sm:$0xff] }
 0x3d7   : > { %v4603_v27 = vpack.c.bf16 %v4836_v12, %v4835_v24 }
 0x3d8   : > { %v4894_v55 = vpop.eup %4893 }
 0x3d9   : > { %v1414_v56 = vsel %vm827_vm6, %v4894_v55, 0.0 }
 0x3da   : > { %1415 = vadd.xlane.f32.xlu0 %v1414_v56 }
 0x3db   : > { %v4896_v57 = vpop.eup %4895 }
 0x3dc   : > { %v1417_v58 = vsel %vm831_vm5, %v4896_v57, 0.0 }
 0x3de   : > { %1418 = vadd.xlane.f32.xlu0 %v1417_v58 }
 0x467   : > { %v1416_v61 = vpop.xlane.xlu0 %1415 }
 0x468   : > { %4897 = vrcp.f32 %v1416_v61 }
 0x46b   : > { %v1419_v0 = vpop.xlane.xlu0 %1418 }
 0x46c   : > { %4899 = vrcp.f32 %v1419_v0 }
 0x470   : > { %v4321_v63 = vpop.f32.mrb[2].mxu0 }
 0x471   : > { %v931_v1 = vpop.f32.mrb[3].mxu0 }
 0x472   : > { %v4898_v16 = vpop.eup %4897 }
 0x473   : > { %v1422_v23 = vmul.f32 %v4898_v16, %v4894_v55  ;;  %v2036_v16 = vld [vmem:[%s5844_s8 + $0x10] sm:$0xff] }
 0x474   : > { %v4335_v4 = vpop.f32.mrb[4].mxu0 }
 0x475   : > { %v1136_v5 = vpop.f32.mrb[5].mxu0 }
 0x476   : > { %4338 = vmatprep.mubr.msk.f32.mxu0 %vm733_vm1, %v1136_v5  ;;  %v4900_v22 = vpop.eup %4899 }
 0x477   : > { %4339 = vmatmul.mubr.msk.f32.vlgmr.msra.gmra.mrb[6].mxu0 %vm733_vm1, %v4335_v4  ;;  %v4371_v9 = vpop.f32.mrb[6].mxu1  ;;  %v1423_v26 = vmul.f32 %v4900_v22, %v4896_v57  ;;  %v1941_v4 = vld [vmem:[%s5905_s6 + $0x8] sm:$0xff] }
 0x478   : > { %4342 = vmatpush3.msra.mxu0 %v723_v60  ;;  %4343 = vmatprep.mubr.msk.f32.mxu0 %vm733_vm1, %v931_v1  ;;  %v1677_v11 = vpop.f32.mrb[7].mxu1  ;;  %v1687_v14 = vmul.f32 0.35355338, %v4371_v9  ;;  %v1943_v9 = vld [vmem:[%s5905_s6 + $0x18] sm:$0xff]  ;;  %v2039_v22 = vld [vmem:[%s5844_s8 + $0x28] sm:$0xff] }
 0x479   : > { %4593 = vmatprep.subr.msk.bf16.mxu0 %vm5346_vm9, %v4591_v8  ;;  %v1686_v15 = vmul.f32 0.35355338, %v1677_v11 }
 0x47a   : > { %v1689_v21 = vsel %vm824_vm4, %v1687_v14, -1e+30  ;;  %v2034_v14 = vld [vmem:[%s5844_s8] sm:$0xff] }
 0x47b   : > { %v1688_v18 = vsel %vm824_vm4, %v1686_v15, -1e+30  ;;  %v1693_v25 = vsel %vm831_vm5, %v1689_v21, -inf  ;;  %v2035_v15 = vld [vmem:[%s5844_s8 + $0x8] sm:$0xff] }
 0x47c   : > { %v1690_v20 = vsel %vm827_vm6, %v1688_v18, -inf }
 0x47d   : > { %1691 = vmax.xlane.f32.xlu0 %v1690_v20  ;;  %v4621_v20 = vpack.c.bf16 %v2037_v19, %v2036_v16 }
 0x47f   : > { %4344 = vmatmul.mubr.msk.f32.vlgmr.msra.gmra.mrb[6].mxu0 %vm733_vm1, %v4321_v63 }
 0x480   : > { %4596 = vmatpush3.bf16.msk.msra.mxu0 %vm5346_vm9, %v4591_v8  ;;  %4357 = vmatprep.mubr.msk.f32.mxu0 %vm827_vm6, %v1422_v23  ;;  %v1942_v8 = vld [vmem:[%s5905_s6 + $0x10] sm:$0xff] }
 0x481   : > { %1694 = vmax.xlane.f32.xlu0 %v1693_v25  ;;  %4360 = vmatprep.subr.mxu0 %v725_v10  ;;  %v4613_v11 = vpack.c.bf16 %v1943_v9, %v1942_v8  ;;  %v4069_v8 = vld [vmem:[%s5895_s29 + $0x38] sm:$0xff] }
 0x483   : > { %4358 = vmatmul.mubr.msk.f32.vlgmr.msra.gmra.mrb[8].mxu0 %vm827_vm6, %v1423_v26 }
 0x484   : > { %4361 = vmatpush3.msra.mxu0 %v725_v10 }
 0x485   : > { %4605 = vmatprep.subr.msk.bf16.mxu0 %vm5346_vm9, %v4603_v27 }
 0x50a   : > { %v1692_v28 = vpop.xlane.xlu0 %1691 }
 0x50b   : > { %v1696_v29 = vsub.f32 %v1688_v18, %v1692_v28  ;;  %v4617_v18 = vpack.c.bf16 %v2035_v15, %v2034_v14 }
 0x50d   : > { %v1698_v30 = vmul.f32 1.442695, %v1696_v29  ;;  %v4056_v29 = vld [vmem:[%s5846_s10] ss:$0 sm:$0xff] }
 0x50e   : > { %v1695_v31 = vpop.xlane.xlu0 %1694 }
 0x50f   : > { %4901 = vpow2.f32 %v1698_v30  ;;  %v1697_v32 = vsub.f32 %v1689_v21, %v1695_v31  ;;  %v2038_v21 = vld [vmem:[%s5844_s8 + $0x20] sm:$0xff] }
 0x510   : > { %v4625_v23 = vpack.c.bf16 %v2039_v22, %v2038_v21  ;;  %v4057_v31 = vld [vmem:[%s5847_s11] ss:$0 sm:$0xff] }
 0x511   : > { %v1700_v33 = vmul.f32 1.442695, %v1697_v32  ;;  %v4064_v21 = vld [vmem:[%s5848_s12] ss:$0 sm:$0xff] }
 0x513   : > { %4903 = vpow2.f32 %v1700_v33 }
 0x519   : > { %v4902_v34 = vpop.eup %4901 }
 0x51a   : > { %v1702_v35 = vsel %vm827_vm6, %v4902_v34, 0.0 }
 0x51b   : > { %1703 = vadd.xlane.f32.xlu0 %v1702_v35 }
 0x51d   : > { %v4904_v36 = vpop.eup %4903 }
 0x51e   : > { %v1705_v38 = vsel %vm831_vm5, %v4904_v36, 0.0 }
 0x51f   : > { %1706 = vadd.xlane.f32.xlu0 %v1705_v38 }
 0x556   : > { %v4359_v39 = vpop.f32.mrb[8].mxu0 }
 0x557   : > { %v1503_v40 = vpop.f32.mrb[9].mxu0 }
 0x558   : > { %4362 = vmatprep.mubr.msk.f32.mxu0 %vm733_vm1, %v1503_v40  ;;  %v2041_v40 = vld [vmem:[%s5844_s8 + $0x38] sm:$0xff] }
 0x559   : > { %4363 = vmatmul.mubr.msk.f32.vlgmr.msra.gmra.mrb[6].mxu0 %vm733_vm1, %v4359_v39  ;;  %v2040_v39 = vld [vmem:[%s5844_s8 + $0x30] sm:$0xff] }
 0x55a   : > { %4608 = vmatpush3.bf16.msk.msra.mxu0 %vm5346_vm9, %v4603_v27 }
 0x55b   : > { %4379 = vmatprep.subr.mxu0 %v726_v41 }
 0x5a8   : > { %v1704_v42 = vpop.xlane.xlu0 %1703 }
 0x5a9   : > { %4905 = vrcp.f32 %v1704_v42  ;;  %v4058_v42 = vld [vmem:[%s5843_s7] ss:$0 sm:$0xff] }
 0x5ac   : > { %v1707_v43 = vpop.xlane.xlu0 %1706 }
 0x5ad   : > { %4907 = vrcp.f32 %v1707_v43 }
 0x5b3   : > { %v4906_v44 = vpop.eup %4905 }
 0x5b4   : > { %v1710_v45 = vmul.f32 %v4906_v44, %v4902_v34 }
 0x5b6   : > { %4376 = vmatprep.mubr.msk.f32.mxu0 %vm827_vm6, %v1710_v45 }
 0x5b7   : > { %v4908_v46 = vpop.eup %4907 }
 0x5b8   : > { %v1711_v47 = vmul.f32 %v4908_v46, %v4904_v36 }
 0x5ba   : > { %4377 = vmatmul.mubr.msk.f32.vlgmr.msra.gmra.mrb[10].mxu0 %vm827_vm6, %v1711_v47 }
 0x5bb   : > { %4380 = vmatpush3.msra.mxu0 %v726_v41  ;;  %v4629_v41 = vpack.c.bf16 %v2041_v40, %v2040_v39 }
 0x5bc   : > { %4618 = vmatprep.subr.bf16.mxu0 %v4617_v18 }
 0x68d   : > { %v4378_v48 = vpop.f32.mrb[10].mxu0 }
 0x68e   : > { %v1791_v49 = vpop.f32.mrb[11].mxu0 }
 0x68f   : > { %4381 = vmatprep.mubr.msk.f32.mxu0 %vm733_vm1, %v1791_v49  ;;  %v4061_v49 = vld [vmem:[%s5845_s9] ss:$0 sm:$0xff] }
 0x690   : > { %4382 = vmatmul.mubr.msk.f32.vlgmr.msra.gmra.mrb[6].mxu0 %vm733_vm1, %v4378_v48 }
 0x691   : > { %4620 = vmatpush3.bf16.msra.mxu0 %v4617_v18 }
 0x692   : > { %4622 = vmatprep.subr.bf16.mxu0 %v4621_v20 }
 0x695   : > { %4624 = vmatpush3.bf16.msra.mxu0 %v4621_v20 }
 0x696   : > { %4626 = vmatprep.subr.bf16.mxu0 %v4625_v23 }
 0x699   : > { %4628 = vmatpush3.bf16.msra.mxu0 %v4625_v23  ;;  %v4065_v23 = vld [vmem:[%s5849_s13] ss:$0 sm:$0xff] }
 0x69a   : > { %4630 = vmatprep.subr.bf16.mxu0 %v4629_v41 }
 0x69d   : > { %4632 = vmatpush3.bf16.msra.mxu0 %v4629_v41 }
 0x763   : > { %v4383_v51 = vpop.f32.mrb[6].mxu0 }
 0x764   : > { %v1891_v52 = vadd.f32 %v4383_v51, %v4055_v50  ;;  %v1872_v53 = vpop.f32.mrb[7].mxu0 }
 0x765   : > { %v1890_v54 = vadd.f32 %v4055_v50, %v1872_v53 }
 0x766   : > { %v1893_v55 = vadd.f32 %v1891_v52, %v5241_v7 }
 0x767   : > { %v1892_v56 = vadd.f32 %v1890_v54, %v5237_v6  ;;  %v1940_v6 = vld [vmem:[%s5905_s6] sm:$0xff] }
 0x768   : > { %v1900_v57 = vsel %vm1899_vm10, %v1893_v55, 0.0  ;;  %v4609_v5 = vpack.c.bf16 %v1941_v4, %v1940_v6  ;;  %v4067_v6 = vld [vmem:[%s5895_s29 + $0x28] sm:$0xff] }
 0x769   : > { %1901 = vadd.xlane.f32.xlu1 %v1900_v57  ;;  %v1896_v58 = vsel %vm641_vm0, %v1892_v56, 0.0 }
 0x76a   : > { %1897 = vadd.xlane.f32.xlu0 %v1896_v58  ;;  %4610 = vmatprep.subr.bf16.mxu1 %v4609_v5 }
 0x76b   : > { %4612 = vmatpush3.bf16.msra.mxu1 %v4609_v5  ;;  %v4068_v5 = vld [vmem:[%s5895_s29 + $0x30] sm:$0xff] }
 0x76c   : > { %4614 = vmatprep.subr.bf16.mxu1 %v4613_v11  ;;  %v4637_v9 = vpack.c.bf16 %v4069_v8, %v4068_v5 }
 0x76f   : > { %4616 = vmatpush3.bf16.msra.mxu1 %v4613_v11 }
 0x7f6   : > { %v1902_v59 = vpop.xlane.xlu1 %1901 }
 0x7f7   : > { %v1905_v60 = vmul.f32 0.03125, %v1902_v59  ;;  %v1898_v61 = vpop.xlane.xlu0 %1897 }
 0x7f8   : > { %v1904_v62 = vmul.f32 0.03125, %v1898_v61 }
 0x7f9   : > { %v1907_v63 = vsub.f32 %v1893_v55, %v1905_v60 }
 0x7fa   : > { %v1906_v0 = vsub.f32 %v1892_v56, %v1904_v62 }
 0x7fb   : > { %v1909_v3 = vmul.f32 %v1907_v63, %v1907_v63 }
 0x7fc   : > { %v1908_v1 = vmul.f32 %v1906_v0, %v1906_v0 }
 0x7fd   : > { %v1913_v7 = vsel %vm1899_vm10, %v1909_v3, 0.0 }
 0x7fe   : > { %v1910_v2 = vsel %vm641_vm0, %v1908_v1, 0.0 }
 0x7ff   : > { %1911 = vadd.xlane.f32.xlu0 %v1910_v2 }
 0x803   : > { %1914 = vadd.xlane.f32.xlu0 %v1913_v7  ;;  %v4066_v7 = vld [vmem:[%s5895_s29 + $0x20] sm:$0xff] }
 0x804   : > { %v4633_v4 = vpack.c.bf16 %v4067_v6, %v4066_v7 }
 0x806   : > { %4634 = vmatprep.subr.bf16.mxu1 %v4633_v4 }
 0x88c   : > { %v1912_v10 = vpop.xlane.xlu0 %1911 }
 0x88d   : > { %v1916_v12 = vmul.f32 0.03125, %v1912_v10 }
 0x88f   : > { %v1918_v24 = vadd.f32 1e-05, %v1916_v12 }
 0x890   : > { %v1915_v25 = vpop.xlane.xlu0 %1914 }
 0x891   : > { %4909 = vrsqrt.f32 %v1918_v24  ;;  %v1917_v26 = vmul.f32 0.03125, %v1915_v25 }
 0x893   : > { %v1919_v27 = vadd.f32 1e-05, %v1917_v26 }
 0x895   : > { %4911 = vrsqrt.f32 %v1919_v27 }
 0x89b   : > { %v4910_v28 = vpop.eup %4909 }
 0x89c   : > { %v1922_v30 = vmul.f32 %v4910_v28, %v1906_v0  ;;  %v4071_v28 = vld [vmem:[%s5897_s24 + $0x1] ss:$0 sm:$0xff] }
 0x89e   : > { %v1930_v32 = vmul.f32 %v4056_v29, %v1922_v30 }
 0x89f   : > { %v4912_v33 = vpop.eup %4911 }
 0x8a0   : > { %v1923_v34 = vmul.f32 %v4912_v33, %v1907_v63  ;;  %v1938_v35 = vadd.f32 %v4057_v31, %v1930_v32 }
 0x8a2   : > { %v1931_v36 = vmul.f32 %v4056_v29, %v1923_v34  ;;  %4392 = vmatprep.mubr.msk.f32.mxu1 %vm641_vm0, %v1938_v35 }
 0x8a4   : > { %v1939_v38 = vadd.f32 %v4057_v31, %v1931_v36 }
 0x8a6   : > { %4393 = vmatmul.mubr.msk.f32.vlgmr.msra.gmra.mrb[8].mxu1 %vm641_vm0, %v1939_v38 }
 0x8a7   : > { %4636 = vmatpush3.bf16.msra.mxu1 %v4633_v4 }
 0x8a8   : > { %4638 = vmatprep.subr.bf16.mxu1 %v4637_v9 }
 0x8ab   : > { %4640 = vmatpush3.bf16.msra.mxu1 %v4637_v9 }
 0x979   : > { %v4394_v43 = vpop.f32.mrb[8].mxu1 }
 0x97a   : > { %v2029_v44 = vadd.f32 %v4394_v43, %v4058_v42  ;;  %v2023_v45 = vpop.f32.mrb[9].mxu1 }
 0x97b   : > { %v2024_v46 = vadd.f32 %v4058_v42, %v2023_v45 }
 0x97c   : > { %v2033_v48 = vmax.f32 %v2029_v44, 0.0 }
 0x97d   : > { %v2032_v47 = vmax.f32 %v2024_v46, 0.0 }
 0x97f   : > { %4411 = vmatprep.mubr.msk.f32.mxu0 %vm2049_vm11, %v2032_v47 }
 0x980   : > { %4412 = vmatmul.mubr.msk.f32.vlgmr.msra.gmra.mrb[12].mxu0 %vm2049_vm11, %v2033_v48 }
 0xa53   : > { %v4413_v50 = vpop.f32.mrb[12].mxu0 }
 0xa54   : > { %v2122_v51 = vpop.f32.mrb[13].mxu0  ;;  %v2128_v52 = vadd.f32 %v4413_v50, %v4061_v49 }
 0xa55   : > { %v2123_v53 = vadd.f32 %v4061_v49, %v2122_v51 }
 0xa56   : > { %v2132_v56 = vadd.f32 %v2128_v52, %v1939_v38 }
 0xa57   : > { %v2131_v54 = vadd.f32 %v2123_v53, %v1938_v35 }
 0xa58   : > { %v2138_v57 = vsel %vm1899_vm10, %v2132_v56, 0.0 }
 0xa59   : > { %v2135_v55 = vsel %vm641_vm0, %v2131_v54, 0.0 }
 0xa5a   : > { %2136 = vadd.xlane.f32.xlu0 %v2135_v55 }
 0xa5e   : > { %2139 = vadd.xlane.f32.xlu0 %v2138_v57 }
 0xae7   : > { %v2137_v58 = vpop.xlane.xlu0 %2136 }
 0xae8   : > { %v2141_v59 = vmul.f32 0.03125, %v2137_v58 }
 0xaea   : > { %v2143_v60 = vsub.f32 %v2131_v54, %v2141_v59 }
 0xaeb   : > { %v2140_v61 = vpop.xlane.xlu0 %2139 }
 0xaec   : > { %v2142_v62 = vmul.f32 0.03125, %v2140_v61  ;;  %v2145_v63 = vmul.f32 %v2143_v60, %v2143_v60 }
 0xaee   : > { %v2144_v0 = vsub.f32 %v2132_v56, %v2142_v62  ;;  %v2147_v1 = vsel %vm641_vm0, %v2145_v63, 0.0 }
 0xaef   : > { %2148 = vadd.xlane.f32.xlu0 %v2147_v1 }
 0xaf0   : > { %v2146_v2 = vmul.f32 %v2144_v0, %v2144_v0 }
 0xaf2   : > { %v2150_v3 = vsel %vm1899_vm10, %v2146_v2, 0.0 }
 0xaf3   : > { %2151 = vadd.xlane.f32.xlu0 %v2150_v3 }
 0xb7c   : > { %v2149_v11 = vpop.xlane.xlu0 %2148 }
 0xb7d   : > { %v2153_v14 = vmul.f32 0.03125, %v2149_v11 }
 0xb7f   : > { %v2155_v15 = vadd.f32 1e-05, %v2153_v14 }
 0xb80   : > { %v2152_v16 = vpop.xlane.xlu0 %2151 }
 0xb81   : > { %4913 = vrsqrt.f32 %v2155_v15  ;;  %v2154_v18 = vmul.f32 0.03125, %v2152_v16 }
 0xb83   : > { %v2156_v19 = vadd.f32 1e-05, %v2154_v18 }
 0xb85   : > { %4915 = vrsqrt.f32 %v2156_v19 }
 0xb8b   : > { %v4914_v20 = vpop.eup %4913 }
 0xb8c   : > { %v2159_v22 = vmul.f32 %v4914_v20, %v2143_v60 }
 0xb8e   : > { %v2167_v10 = vmul.f32 %v4064_v21, %v2159_v22 }
 0xb8f   : > { %v4916_v12 = vpop.eup %4915 }
 0xb90   : > { %v2160_v24 = vmul.f32 %v4916_v12, %v2144_v0  ;;  %v5494_v25 = vadd.f32 %v4065_v23, %v2167_v10 }
 0xb92   : > { %v2168_v26 = vmul.f32 %v4064_v21, %v2160_v24  ;;  %4422 = vmatprep.mubr.msk.f32.mxu1 %vm641_vm0, %v5494_v25 }
 0xb94   : > { %v5498_v27 = vadd.f32 %v4065_v23, %v2168_v26 }
 0xb96   : > { %4423 = vmatmul.mubr.msk.f32.vlgmr.msra.gmra.mrb[10].mxu1 %vm641_vm0, %v5498_v27 }
 0xc69   : > { %v4424_v29 = vpop.f32.mrb[10].mxu1 }
 0xc6a   : > { %v5505_v30 = vadd.f32 %v4424_v29, %v4071_v28  ;;  %v2262_v31 = vpop.f32.mrb[11].mxu1 }
 0xc6b   : > { %v5507_v32 = vadd.f32 %v4071_v28, %v2262_v31 }
 0xc6d   : > { %4429 = vmatprep.mubr.msk.f32.mxu1 %vm733_vm1, %v5507_v32  ;;  %v5513_v33 = vpack.i.bf16 %v5505_v30, %v5507_v32 }
 0xc6f   : > { %4843 = vrot.lane.b32.xlu1 %v5513_v33, %s5906_s22  ;;  %4838 = vrot.lane.b32.xlu0 %v5513_v33, %s5907_s23 }
 0xc73   : > { %4848 = vrot.lane.b32.xlu1 %v5513_v33, %s5908_s20  ;;  %2479 = vrot.lane.b32.xlu0 %v5507_v32, %s5909_s2 }
 0xc77   : > { %2848 = vrot.lane.b32.xlu1 %v5505_v30, %s5910_s0  ;;  %2481 = vrot.lane.b32.xlu0 %v5505_v30, %s5909_s2  ;;  %s5741_s2 = sand.u32 1, %s5041_s30  }
 0xc7b   : > { %2846 = vrot.lane.b32.xlu0 %v5507_v32, %s5910_s0  ;;  %s5878_s0 = sshll.u32 %s5741_s2, 1 }
 0xce1   : > { %v4844_v34 = vpop.permute.xlu1 %4843  ;;  %v4839_v35 = vpop.permute.xlu0 %4838 }
 0xce2   : > { %v4846_v36 = vunpack.i.h.bf16 %v4844_v34  ;;  %v4845_v38 = vunpack.i.l.bf16 %v4844_v34  ;;  %v4841_v39 = vunpack.i.h.bf16 %v4839_v35  ;;  %v4840_v40 = vunpack.i.l.bf16 %v4839_v35 }
 0xce4   : > { %v4641_v41 = vpack.c.bf16 %v4841_v39, %v4840_v40  ;;  %v4653_v42 = vpack.c.bf16 %v4846_v36, %v4845_v38 }
 0xce5   : > { %v4849_v43 = vpop.permute.xlu1 %4848  ;;  %v2480_v46 = vpop.permute.xlu0 %2479 }
 0xce6   : > { %4643 = vmatprep.subr.msk.bf16.mxu1 %vm5274_vm2, %v4641_v41  ;;  %v4851_v44 = vunpack.i.h.bf16 %v4849_v43  ;;  %v4850_v45 = vunpack.i.l.bf16 %v4849_v43 }
 0xce7   : > { %4646 = vmatpush3.bf16.xpose.msk.msra.mxu1 %vm5274_vm2, %v4641_v41 }
 0xce8   : > { %4655 = vmatprep.subr.msk.bf16.mxu1 %vm5274_vm2, %v4653_v42  ;;  %v4665_v47 = vpack.c.bf16 %v4851_v44, %v4850_v45 }
 0xce9   : > { %v2482_v48 = vpop.permute.xlu0 %2481  ;;  %v2849_v50 = vpop.permute.xlu1 %2848 }
 0xced   : > { %v2847_v49 = vpop.permute.xlu0 %2846 }
 0xcee   : > { %4430 = vmatmul.mubr.msk.f32.vlgmr.msra.gmra.mrb[12].mxu1 %vm733_vm1, %v5505_v30 }
 0xcef   : > { %4658 = vmatpush3.bf16.xpose.msk.msra.mxu1 %vm5274_vm2, %v4653_v42  ;;  %4443 = vmatprep.mubr.msk.f32.mxu1 %vm733_vm1, %v2480_v46 }
 0xcf0   : > { %4667 = vmatprep.subr.msk.bf16.mxu1 %vm5274_vm2, %v4665_v47 }
 0xcf6   : > { %4444 = vmatmul.mubr.msk.f32.vlgmr.msra.gmra.mrb[14].mxu1 %vm733_vm1, %v2482_v48 }
 0xcf7   : > { %4670 = vmatpush3.bf16.xpose.msk.msra.mxu1 %vm5274_vm2, %v4665_v47  ;;  %4467 = vmatprep.mubr.msk.f32.mxu1 %vm733_vm1, %v2847_v49 }
 0xcfe   : > { %4468 = vmatmul.mubr.msk.f32.vlgmr.msra.gmra.mrb[16].mxu1 %vm733_vm1, %v2849_v50 }
 0xdc1   : > { %v4431_v51 = vpop.f32.mrb[12].mxu1 }
 0xdc2   : > { %v2366_v52 = vmul.f32 0.35355338, %v4431_v51  ;;  %v2356_v53 = vpop.f32.mrb[13].mxu1 }
 0xdc3   : > { %v2365_v54 = vmul.f32 0.35355338, %v2356_v53 }
 0xdc4   : > { %v2368_v55 = vsel %vm824_vm4, %v2366_v52, -1e+30 }
 0xdc5   : > { %v2372_v56 = vsel %vm831_vm5, %v2368_v55, -inf  ;;  %v2367_v57 = vsel %vm824_vm4, %v2365_v54, -1e+30 }
 0xdc6   : > { %2373 = vmax.xlane.f32.xlu1 %v2372_v56  ;;  %v2369_v58 = vsel %vm827_vm6, %v2367_v57, -inf }
 0xdc7   : > { %2370 = vmax.xlane.f32.xlu0 %v2369_v58 }
 0xdc9   : > { %v4445_v59 = vpop.f32.mrb[14].mxu1 }
 0xdca   : > { %v2561_v60 = vpop.f32.mrb[15].mxu1  ;;  %v2571_v61 = vmul.f32 0.35355338, %v4445_v59 }
 0xdcb   : > { %v2570_v62 = vmul.f32 0.35355338, %v2561_v60 }
 0xdcc   : > { %v2573_v1 = vsel %vm824_vm4, %v2571_v61, -1e+30 }
 0xdcd   : > { %v2572_v63 = vsel %vm824_vm4, %v2570_v62, -1e+30  ;;  %v2577_v7 = vsel %vm831_vm5, %v2573_v1, -inf }
 0xdce   : > { %v2574_v0 = vsel %vm827_vm6, %v2572_v63, -inf }
 0xdcf   : > { %2575 = vmax.xlane.f32.xlu0 %v2574_v0 }
 0xdd1   : > { %v4469_v2 = vpop.f32.mrb[16].mxu1 }
 0xdd2   : > { %v2928_v3 = vpop.f32.mrb[17].mxu1  ;;  %v2938_v29 = vmul.f32 0.35355338, %v4469_v2 }
 0xdd3   : > { %2578 = vmax.xlane.f32.xlu0 %v2577_v7  ;;  %v2937_v31 = vmul.f32 0.35355338, %v2928_v3 }
 0xdd4   : > { %v2940_v35 = vsel %vm824_vm4, %v2938_v29, -1e+30 }
 0xdd5   : > { %v2939_v34 = vsel %vm824_vm4, %v2937_v31, -1e+30  ;;  %v2944_v38 = vsel %vm831_vm5, %v2940_v35, -inf }
 0xdd6   : > { %v2941_v36 = vsel %vm827_vm6, %v2939_v34, -inf }
 0xe53   : > { %v2374_v6 = vpop.xlane.xlu1 %2373 }
 0xe54   : > { %v2376_v4 = vsub.f32 %v2368_v55, %v2374_v6  ;;  %v2371_v5 = vpop.xlane.xlu0 %2370 }
 0xe55   : > { %v2375_v8 = vsub.f32 %v2367_v57, %v2371_v5 }
 0xe56   : > { %v2379_v9 = vmul.f32 1.442695, %v2376_v4 }
 0xe57   : > { %v2377_v11 = vmul.f32 1.442695, %v2375_v8  ;;  %v4075_v8 = vld [vmem:[%s5903_s4 + $0x28] sm:$0xff] }
 0xe58   : > { %4917 = vpow2.f32 %v2379_v9  ;;  %v4074_v9 = vld [vmem:[%s5903_s4 + $0x20] sm:$0xff] }
 0xe59   : > { %4919 = vpow2.f32 %v2377_v11 }
 0xe5c   : > { %v2576_v14 = vpop.xlane.xlu0 %2575 }
 0xe5d   : > { %v2580_v15 = vsub.f32 %v2572_v63, %v2576_v14 }
 0xe5f   : > { %v2582_v16 = vmul.f32 1.442695, %v2580_v15 }
 0xe60   : > { %v2579_v18 = vpop.xlane.xlu0 %2578 }
 0xe61   : > { %4921 = vpow2.f32 %v2582_v16  ;;  %v2581_v19 = vsub.f32 %v2573_v1, %v2579_v18 }
 0xe62   : > { %v4918_v20 = vpop.eup %4917 }
 0xe63   : > { %v4920_v21 = vpop.eup %4919  ;;  %v2584_v22 = vmul.f32 1.442695, %v2581_v19  ;;  %v2384_v23 = vsel %vm831_vm5, %v4918_v20, 0.0 }
 0xe64   : > { %2385 = vadd.xlane.f32.xlu0 %v2384_v23  ;;  %v2381_v10 = vsel %vm827_vm6, %v4920_v21, 0.0 }
 0xe65   : > { %4923 = vpow2.f32 %v2584_v22  ;;  %2382 = vadd.xlane.f32.xlu1 %v2381_v10 }
 0xe6b   : > { %v4922_v12 = vpop.eup %4921 }
 0xe6c   : > { %v2586_v24 = vsel %vm827_vm6, %v4922_v12, 0.0 }
 0xe6d   : > { %2587 = vadd.xlane.f32.xlu1 %v2586_v24 }
 0xe6f   : > { %v4924_v26 = vpop.eup %4923 }
 0xe70   : > { %v2589_v28 = vsel %vm831_vm5, %v4924_v26, 0.0 }
 0xe71   : > { %2590 = vadd.xlane.f32.xlu0 %v2589_v28 }
 0xe7e   : > { %4853 = vrot.lane.b32.xlu1 %v5513_v33, %s5911_s21  ;;  %s3877_s21 = scalar_lea.sflag [#allocation3], %s5741_s2 }
 0xe82   : > { %4863 = vrot.lane.b32.xlu1 %v5513_v33, %s5912_s26  ;;  %s5916_s26 = smov 40  }
 0xe86   : > { %3134 = vrot.lane.b32.xlu1 %v5507_v32, %s5913_s27 }
 0xe87   : > { %4858 = vrot.lane.b32.xlu0 %v5513_v33, %s5914_s25  ;;  %s610_s25 = scalar_lea.vmem [#allocation2], %s5878_s0  ;;  %s5067_s0 = smov [#allocation2]  }
 0xe8b   : > { %3136 = vrot.lane.b32.xlu0 %v5505_v30, %s5913_s27  ;;  %s5879_s27 = sshll.u32 %s5190_s1, 5 }
 0xe8c   : > { %s5755_s20 = scalar_lea.hbm %s5854_s18, %s5879_s27 }
 0xeaa   : > { %2942 = vmax.xlane.f32.xlu1 %v2941_v36  ;;  %2945 = vmax.xlane.f32.xlu0 %v2944_v38 }
 0xef1   : > { %v2386_v39 = vpop.xlane.xlu0 %2385 }
 0xef2   : > { %v2383_v32 = vpop.xlane.xlu1 %2382 }
 0xef3   : > { %4925 = vrcp.f32 %v2383_v32 }
 0xef4   : > { %4927 = vrcp.f32 %v2386_v39  ;;  %v4076_v39 = vld [vmem:[%s5903_s4 + $0x30] sm:$0xff] }
 0xefa   : > { %v2588_v40 = vpop.xlane.xlu1 %2587 }
 0xefb   : > { %4929 = vrcp.f32 %v2588_v40 }
 0xefd   : > { %v4926_v30 = vpop.eup %4925 }
 0xefe   : > { %v4854_v41 = vpop.permute.xlu1 %4853  ;;  %v2591_v42 = vpop.xlane.xlu0 %2590  ;;  %v2389_v43 = vmul.f32 %v4926_v30, %v4920_v21 }
 0xeff   : > { %v4856_v44 = vunpack.i.h.bf16 %v4854_v41  ;;  %v4855_v45 = vunpack.i.l.bf16 %v4854_v41  ;;  %4931 = vrcp.f32 %v2591_v42  ;;  %v4928_v47 = vpop.eup %4927 }
 0xf00   : > { %4436 = vmatprep.mubr.msk.f32.mxu0 %vm827_vm6, %v2389_v43  ;;  %v2390_v55 = vmul.f32 %v4928_v47, %v4918_v20 }
 0xf01   : > { %v4647_v46 = vpack.c.bf16 %v4856_v44, %v4855_v45 }
 0xf02   : > { %v4864_v48 = vpop.permute.xlu1 %4863  ;;  %v4859_v49 = vpop.permute.xlu0 %4858 }
 0xf03   : > { %v4866_v50 = vunpack.i.h.bf16 %v4864_v48  ;;  %v4865_v51 = vunpack.i.l.bf16 %v4864_v48  ;;  %v4861_v52 = vunpack.i.h.bf16 %v4859_v49  ;;  %v4860_v53 = vunpack.i.l.bf16 %v4859_v49  ;;  %4649 = vmatprep.subr.msk.bf16.mxu0 %vm5346_vm9, %v4647_v46 }
 0xf04   : > { %4652 = vmatpush3.bf16.msk.msra.mxu0 %vm5346_vm9, %v4647_v46 }
 0xf05   : > { %v4930_v54 = vpop.eup %4929  ;;  %v4677_v56 = vpack.c.bf16 %v4866_v50, %v4865_v51  ;;  %v4659_v57 = vpack.c.bf16 %v4861_v52, %v4860_v53 }
 0xf06   : > { %v3135_v58 = vpop.permute.xlu1 %3134  ;;  %v2594_v59 = vmul.f32 %v4930_v54, %v4922_v12  ;;  %v3137_v62 = vpop.permute.xlu0 %3136 }
 0xf07   : > { %4437 = vmatmul.mubr.msk.f32.vlgmr.msra.gmra.mrb[14].mxu0 %vm827_vm6, %v2390_v55  ;;  %4661 = vmatprep.subr.msk.bf16.mxu0 %vm5346_vm9, %v4659_v57 }
 0xf08   : > { %4679 = vmatprep.subr.msk.bf16.mxu1 %vm5274_vm2, %v4677_v56  ;;  %4486 = vmatprep.mubr.msk.f32.mxu1 %vm733_vm1, %v3135_v58 }
 0xf09   : > { %v4932_v60 = vpop.eup %4931  ;;  %4664 = vmatpush3.bf16.msk.msra.mxu0 %vm5346_vm9, %v4659_v57  ;;  %4450 = vmatprep.mubr.msk.f32.mxu0 %vm827_vm6, %v2594_v59 }
 0xf0a   : > { %v2595_v61 = vmul.f32 %v4932_v60, %v4924_v26  ;;  %4682 = vmatpush3.bf16.xpose.msk.msra.mxu1 %vm5274_vm2, %v4677_v56  ;;  %4453 = vmatprep.subr.mxu0 %v4075_v8  ;;  %v4077_v56 = vld [vmem:[%s5903_s4 + $0x38] sm:$0xff]  ;;  %s4959_s4 = sshll.u32 %s5067_s0, 4  ;;  %s4960_s4 = int_to_ptr.vmem [resolvable:$false] %s4959_s4 }
 0xf0b   : > { %s4961_s5 = scalar_lea.vmem %s4960_s4, 64 }
 0xf0c   : > { %4451 = vmatmul.mubr.msk.f32.vlgmr.msra.gmra.mrb[16].mxu0 %vm827_vm6, %v2595_v61 }
 0xf0d   : > { %4454 = vmatpush3.msra.mxu0 %v4075_v8 }
 0xf0e   : > { %4458 = vmatprep.subr.mxu0 %v4074_v9 }
 0xf11   : > { %4487 = vmatmul.mubr.msk.f32.vlgmr.msra.gmra.mrb[18].mxu1 %vm733_vm1, %v3137_v62 }
 0xf37   : > { %v2943_v63 = vpop.xlane.xlu1 %2942  ;;  %v2946_v0 = vpop.xlane.xlu0 %2945 }
 0xf38   : > { %v2947_v1 = vsub.f32 %v2939_v34, %v2943_v63  ;;  %v2948_v2 = vsub.f32 %v2940_v35, %v2946_v0 }
 0xf3a   : > { %v2949_v3 = vmul.f32 1.442695, %v2947_v1  ;;  %v2951_v7 = vmul.f32 1.442695, %v2948_v2 }
 0xf3c   : > { %4933 = vpow2.f32 %v2949_v3 }
 0xf3d   : > { %4935 = vpow2.f32 %v2951_v7 }
 0xf46   : > { %v4934_v6 = vpop.eup %4933 }
 0xf47   : > { %v4936_v4 = vpop.eup %4935  ;;  %v2953_v5 = vsel %vm827_vm6, %v4934_v6, 0.0 }
 0xf48   : > { %2954 = vadd.xlane.f32.xlu0 %v2953_v5  ;;  %v2956_v17 = vsel %vm831_vm5, %v4936_v4, 0.0 }
 0xf49   : > { %2957 = vadd.xlane.f32.xlu1 %v2956_v17 }
 0xf5e   : > { %4868 = vrot.lane.b32.xlu0 %v5513_v33, %s5915_s28  ;;  %s3895_s28 = sshll.u32 %s610_s25, 4  ;;  %s5757_s28 = int_to_ptr.vmem [resolvable:$true] %s3895_s28 }
 0xf5f   : > { %p4962_p0 = scmp.lt.s32.totalorder %s5757_s28, %s4960_s4 }
 0xfd5   : > { %v2955_v11 = vpop.xlane.xlu0 %2954 }
 0xfd6   : > { %v2958_v18 = vpop.xlane.xlu1 %2957  ;;  %4937 = vrcp.f32 %v2955_v11 }
 0xfd7   : > { %4939 = vrcp.f32 %v2958_v18  ;;  %v4121_v18 = vld [vmem:[%s5905_s6 + $0x28] sm:$0xff] }
 0xfd9   : > { %v4869_v15 = vpop.permute.xlu0 %4868 }
 0xfda   : > { %v4438_v14 = vpop.f32.mrb[14].mxu0  ;;  %v4871_v19 = vunpack.i.h.bf16 %v4869_v15  ;;  %v4870_v20 = vunpack.i.l.bf16 %v4869_v15 }
 0xfdb   : > { %v2470_v16 = vpop.f32.mrb[15].mxu0 }
 0xfdc   : > { %v4671_v23 = vpack.c.bf16 %v4871_v19, %v4870_v20  ;;  %v4122_v20 = vld [vmem:[%s5905_s6 + $0x30] sm:$0xff] }
 0xfdf   : > { %v4452_v21 = vpop.f32.mrb[16].mxu0 }
 0xfe0   : > { %v2675_v22 = vpop.f32.mrb[17].mxu0  ;;  %v4938_v24 = vpop.eup %4937 }
 0xfe1   : > { %4455 = vmatprep.mubr.msk.f32.mxu0 %vm733_vm1, %v2675_v22  ;;  %v4940_v31 = vpop.eup %4939  ;;  %v2961_v35 = vmul.f32 %v4938_v24, %v4934_v6 }
 0xfe2   : > { %4456 = vmatmul.mubr.msk.f32.vlgmr.msra.gmra.mrb[18].mxu0 %vm733_vm1, %v4452_v21  ;;  %v2962_v38 = vmul.f32 %v4940_v31, %v4936_v4  ;;  %v4123_v21 = vld [vmem:[%s5905_s6 + $0x38] sm:$0xff]  ;;  %v4133_v31 = vld [vmem:[%s5844_s8 + $0x68] sm:$0xff] }
 0xfe3   : > { %4459 = vmatpush3.msra.mxu0 %v4074_v9  ;;  %4460 = vmatprep.mubr.msk.f32.mxu0 %vm733_vm1, %v2470_v16  ;;  %v4693_v22 = vpack.c.bf16 %v4123_v21, %v4122_v20  ;;  %v3792_v20 = vld [vmem:[%s5852_s16 + $0x8] sm:$0xff]  ;;  %v4143_v21 = vld [vmem:[%s5849_s13 + $0x1] ss:$0 sm:$0xff] }
 0xfe4   : > { %v4488_v10 = vpop.f32.mrb[18].mxu1  ;;  %4673 = vmatprep.subr.msk.bf16.mxu0 %vm5346_vm9, %v4671_v23 }
 0xfe5   : > { %v3216_v12 = vpop.f32.mrb[19].mxu1  ;;  %v3226_v26 = vmul.f32 0.35355338, %v4488_v10  ;;  %v4129_v10 = vld [vmem:[%s5844_s8 + $0x48] sm:$0xff] }
 0xfe6   : > { %v3225_v28 = vmul.f32 0.35355338, %v3216_v12  ;;  %v4130_v12 = vld [vmem:[%s5844_s8 + $0x50] sm:$0xff] }
 0xfe7   : > { %v3228_v36 = vsel %vm824_vm4, %v3226_v26, -1e+30  ;;  %v4131_v26 = vld [vmem:[%s5844_s8 + $0x58] sm:$0xff] }
 0xfe8   : > { %v3227_v29 = vsel %vm824_vm4, %v3225_v28, -1e+30  ;;  %v3232_v32 = vsel %vm831_vm5, %v3228_v36, -inf  ;;  %v4701_v28 = vpack.c.bf16 %v4131_v26, %v4130_v12  ;;  %v3793_v12 = vld [vmem:[%s5852_s16 + $0x10] sm:$0xff] }
 0xfe9   : > { %v3229_v34 = vsel %vm827_vm6, %v3227_v29, -inf }
 0xfea   : > { %3230 = vmax.xlane.f32.xlu1 %v3229_v34  ;;  %4461 = vmatmul.mubr.msk.f32.vlgmr.msra.gmra.mrb[18].mxu0 %vm733_vm1, %v4438_v14 }
 0xfeb   : > { %4676 = vmatpush3.bf16.msk.msra.mxu0 %vm5346_vm9, %v4671_v23  ;;  %4474 = vmatprep.mubr.msk.f32.mxu0 %vm827_vm6, %v2961_v35  ;;  %v4128_v23 = vld [vmem:[%s5844_s8 + $0x40] sm:$0xff] }
 0xfec   : > { %4477 = vmatprep.subr.mxu0 %v4076_v39  ;;  %v4697_v24 = vpack.c.bf16 %v4129_v10, %v4128_v23 }
 0xfee   : > { %3233 = vmax.xlane.f32.xlu1 %v3232_v32  ;;  %4475 = vmatmul.mubr.msk.f32.vlgmr.msra.gmra.mrb[20].mxu0 %vm827_vm6, %v2962_v38 }
 0xfef   : > { %4478 = vmatpush3.msra.mxu0 %v4076_v39 }
0x1077   : > { %v3231_v40 = vpop.xlane.xlu1 %3230 }
0x1078   : > { %v3235_v37 = vsub.f32 %v3227_v29, %v3231_v40  ;;  %v4132_v29 = vld [vmem:[%s5844_s8 + $0x60] sm:$0xff] }
0x1079   : > { %v4705_v34 = vpack.c.bf16 %v4133_v31, %v4132_v29  ;;  %v4144_v29 = vld [vmem:[%s5851_s15] ss:$0 sm:$0xff] }
0x107a   : > { %v3237_v42 = vmul.f32 1.442695, %v3235_v37 }
0x107b   : > { %v3234_v30 = vpop.xlane.xlu1 %3233 }
0x107c   : > { %v3236_v41 = vsub.f32 %v3228_v36, %v3234_v30  ;;  %v4118_v30 = vld [vmem:[%s5846_s10 + $0x1] ss:$0 sm:$0xff] }
0x107e   : > { %v3239_v43 = vmul.f32 1.442695, %v3236_v41 }
0x1080   : > { %4941 = vpow2.f32 %v3239_v43 }
0x1081   : > { %4943 = vpow2.f32 %v3237_v42  ;;  %v4119_v42 = vld [vmem:[%s5847_s11 + $0x1] ss:$0 sm:$0xff] }
0x108a   : > { %v4942_v44 = vpop.eup %4941 }
0x108b   : > { %v3244_v45 = vsel %vm831_vm5, %v4942_v44, 0.0  ;;  %v4944_v46 = vpop.eup %4943 }
0x108c   : > { %3245 = vadd.xlane.f32.xlu1 %v3244_v45  ;;  %v3241_v47 = vsel %vm827_vm6, %v4944_v46, 0.0 }
0x1090   : > { %3242 = vadd.xlane.f32.xlu1 %v3241_v47 }
0x10a1   : > { %4873 = vrot.lane.b32.xlu1 %v5513_v33, %s5916_s26  ;;  %s4955_s26 = scalar_lea.vmem %s5757_s28, 32 }
0x10a2   : > { %p4956_p11 = scmp.ne.s32.totalorder %s5757_s28, %s4955_s26  ;;  %p4963_p1 = scmp.lt.s32.totalorder %s4961_s5, %s4955_s26 }
0x10a4   : > { %p4957_p12 = pnand %p4956_p11, %p5207_p5  ;;  %p4964_p2 = por %p4963_p1, %p4962_p0 }
0x10a6   : > { %p4958_p13 = pneg %p4957_p12 }
0x10a8   : > { %p4965_p3 = pnand %p4964_p2, %p4958_p13 }
0x10c1   : > { %v4476_v48 = vpop.f32.mrb[20].mxu0 }
0x10c2   : > { %v3042_v49 = vpop.f32.mrb[21].mxu0 }
0x10c3   : > { %4479 = vmatprep.mubr.msk.f32.mxu0 %vm733_vm1, %v3042_v49  ;;  %v4134_v49 = vld [vmem:[%s5844_s8 + $0x70] sm:$0xff] }
0x10c4   : > { %4480 = vmatmul.mubr.msk.f32.vlgmr.msra.gmra.mrb[18].mxu0 %vm733_vm1, %v4476_v48 }
0x1119   : > { %v3246_v50 = vpop.xlane.xlu1 %3245 }
0x111a   : > { %4945 = vrcp.f32 %v3246_v50  ;;  %v4135_v50 = vld [vmem:[%s5844_s8 + $0x78] sm:$0xff] }
0x111d   : > { %v3243_v51 = vpop.xlane.xlu1 %3242 }
0x111e   : > { %4947 = vrcp.f32 %v3243_v51  ;;  %v4709_v51 = vpack.c.bf16 %v4135_v50, %v4134_v49 }
0x1121   : > { %v4874_v52 = vpop.permute.xlu1 %4873 }
0x1122   : > { %v4876_v53 = vunpack.i.h.bf16 %v4874_v52  ;;  %v4875_v54 = vunpack.i.l.bf16 %v4874_v52  ;;  %v4125_v52 = vld [vmem:[%s5843_s7 + $0x1] ss:$0 sm:$0xff] }
0x1124   : > { %v4683_v55 = vpack.c.bf16 %v4876_v53, %v4875_v54  ;;  %v4946_v33 = vpop.eup %4945 }
0x1125   : > { %v3250_v59 = vmul.f32 %v4946_v33, %v4942_v44 }
0x1126   : > { %4685 = vmatprep.subr.msk.bf16.mxu0 %vm5346_vm9, %v4683_v55 }
0x1127   : > { %4688 = vmatpush3.bf16.msk.msra.mxu0 %vm5346_vm9, %v4683_v55 }
0x1128   : > { %v4948_v57 = vpop.eup %4947  ;;  %4496 = vmatprep.subr.mxu0 %v4077_v56 }
0x1129   : > { %v3249_v58 = vmul.f32 %v4948_v57, %v4944_v46 }
0x112b   : > { %4493 = vmatprep.mubr.msk.f32.mxu0 %vm827_vm6, %v3249_v58  ;;  %v4137_v58 = vld [vmem:[%s5845_s9 + $0x1] ss:$0 sm:$0xff] }
0x112c   : > { %4494 = vmatmul.mubr.msk.f32.vlgmr.msra.gmra.mrb[22].mxu0 %vm827_vm6, %v3250_v59 }
0x112d   : > { %4497 = vmatpush3.msra.mxu0 %v4077_v56 }
0x112e   : > { %4698 = vmatprep.subr.bf16.mxu0 %v4697_v24 }
0x11ff   : > { %v4495_v60 = vpop.f32.mrb[22].mxu0 }
0x1200   : > { %v3330_v61 = vpop.f32.mrb[23].mxu0 }
0x1201   : > { %4498 = vmatprep.mubr.msk.f32.mxu0 %vm733_vm1, %v3330_v61 }
0x1202   : > { %4499 = vmatmul.mubr.msk.f32.vlgmr.msra.gmra.mrb[18].mxu0 %vm733_vm1, %v4495_v60 }
0x1203   : > { %4700 = vmatpush3.bf16.msra.mxu0 %v4697_v24  ;;  %v3794_v24 = vld [vmem:[%s5852_s16 + $0x18] sm:$0xff] }
0x1204   : > { %4702 = vmatprep.subr.bf16.mxu0 %v4701_v28  ;;  %v4723_v26 = vpack.c.bf16 %v3794_v24, %v3793_v12 }
0x1207   : > { %4704 = vmatpush3.bf16.msra.mxu0 %v4701_v28 }
0x1208   : > { %4706 = vmatprep.subr.bf16.mxu0 %v4705_v34 }
0x120b   : > { %4708 = vmatpush3.bf16.msra.mxu0 %v4705_v34 }
0x120c   : > { %4710 = vmatprep.subr.bf16.mxu0 %v4709_v51 }
0x120f   : > { %4712 = vmatpush3.bf16.msra.mxu0 %v4709_v51 }
0x12d5   : > { %v4500_v62 = vpop.f32.mrb[18].mxu0 }
0x12d6   : > { %v3431_v63 = vadd.f32 %v4500_v62, %v4115_v13  ;;  %v3411_v0 = vpop.f32.mrb[19].mxu0 }
0x12d7   : > { %v3430_v1 = vadd.f32 %v4115_v13, %v3411_v0 }
0x12d8   : > { %v3433_v2 = vadd.f32 %v3431_v63, %v5498_v27 }
0x12d9   : > { %v3432_v3 = vadd.f32 %v3430_v1, %v5494_v25  ;;  %v4120_v25 = vld [vmem:[%s5905_s6 + $0x20] sm:$0xff] }
0x12da   : > { %v3441_v7 = vsel %vm1899_vm10, %v3433_v2, 0.0  ;;  %v4689_v19 = vpack.c.bf16 %v4121_v18, %v4120_v25  ;;  %v4142_v25 = vld [vmem:[%s5848_s12 + $0x1] ss:$0 sm:$0xff] }
0x12db   : > { %3442 = vadd.xlane.f32.xlu1 %v3441_v7  ;;  %v3438_v6 = vsel %vm641_vm0, %v3432_v3, 0.0  ;;  %v3705_v7 = vld [vmem:[%s5850_s14] sm:$0xff] }
0x12dc   : > { %3439 = vadd.xlane.f32.xlu0 %v3438_v6  ;;  %4690 = vmatprep.subr.bf16.mxu1 %v4689_v19  ;;  %v3706_v6 = vld [vmem:[%s5850_s14 + $0x8] sm:$0xff] }
0x12dd   : > { %4692 = vmatpush3.bf16.msra.mxu1 %v4689_v19  ;;  %v3791_v19 = vld [vmem:[%s5852_s16] sm:$0xff] }
0x12de   : > { %4694 = vmatprep.subr.bf16.mxu1 %v4693_v22  ;;  %v4720_v23 = vpack.c.bf16 %v3792_v20, %v3791_v19 }
0x12e1   : > { %4696 = vmatpush3.bf16.msra.mxu1 %v4693_v22 }
0x1368   : > { %v3443_v4 = vpop.xlane.xlu1 %3442 }
0x1369   : > { %v3445_v5 = vmul.f32 0.03125, %v3443_v4  ;;  %v3440_v17 = vpop.xlane.xlu0 %3439  ;;  %v4714_v4 = vpack.c.bf16 %v3706_v6, %v3705_v7 }
0x136a   : > { %v3444_v8 = vmul.f32 0.03125, %v3440_v17  ;;  %v3707_v17 = vld [vmem:[%s5850_s14 + $0x10] sm:$0xff] }
0x136b   : > { %v3447_v9 = vsub.f32 %v3433_v2, %v3445_v5  ;;  %v5064_v5 = vmov 0.0|0.0  }
0x136c   : > { %v3446_v11 = vsub.f32 %v3432_v3, %v3444_v8  ;;  %4713 = vmatprep.subr.bf16.mxu1 %v5064_v5  ;;  %v3708_v8 = vld [vmem:[%s5850_s14 + $0x18] sm:$0xff] }
0x136d   : > { %v3449_v16 = vmul.f32 %v3447_v9, %v3447_v9 }
0x136e   : > { %v3448_v14 = vmul.f32 %v3446_v11, %v3446_v11 }
0x136f   : > { %v3453_v27 = vsel %vm1899_vm10, %v3449_v16, 0.0 }
0x1370   : > { %v3450_v15 = vsel %vm641_vm0, %v3448_v14, 0.0 }
0x1371   : > { %3451 = vadd.xlane.f32.xlu0 %v3450_v15 }
0x1375   : > { %3454 = vadd.xlane.f32.xlu0 %v3453_v27 }
0x13fe   : > { %v3452_v35 = vpop.xlane.xlu0 %3451 }
0x13ff   : > { %v3456_v36 = vmul.f32 0.03125, %v3452_v35 }
0x1401   : > { %v3458_v38 = vadd.f32 1e-05, %v3456_v36 }
0x1402   : > { %v3455_v32 = vpop.xlane.xlu0 %3454 }
0x1403   : > { %4949 = vrsqrt.f32 %v3458_v38  ;;  %v3457_v39 = vmul.f32 0.03125, %v3455_v32 }
0x1405   : > { %v3459_v40 = vadd.f32 1e-05, %v3457_v39 }
0x1407   : > { %4951 = vrsqrt.f32 %v3459_v40 }
0x140d   : > { %v4950_v37 = vpop.eup %4949 }
0x140e   : > { %v3462_v41 = vmul.f32 %v4950_v37, %v3446_v11  ;;  %v5066_v11 = vmov 0.0  }
0x1410   : > { %v3470_v43 = vmul.f32 %v4118_v30, %v3462_v41 }
0x1411   : > { %v4952_v44 = vpop.eup %4951 }
0x1412   : > { %v3463_v45 = vmul.f32 %v4952_v44, %v3447_v9  ;;  %v3478_v46 = vadd.f32 %v4119_v42, %v3470_v43  ;;  %v4717_v9 = vpack.c.bf16 %v3708_v8, %v3707_v17 }
0x1414   : > { %v3471_v47 = vmul.f32 %v4118_v30, %v3463_v45  ;;  %4509 = vmatprep.mubr.msk.f32.mxu1 %vm641_vm0, %v3478_v46 }
0x1416   : > { %v3479_v48 = vadd.f32 %v4119_v42, %v3471_v47 }
0x1418   : > { %4510 = vmatmul.mubr.msk.f32.vlgmr.msra.gmra.mrb[20].mxu1 %vm641_vm0, %v3479_v48 }
0x1419   : > { %4715 = vmatpush3.bf16.msra.mxu1 %v4714_v4  ;;  %4539 = vmatprep.mubr.msk.f32.mxu1 %vm5065_vm12, %v5066_v11 }
0x141a   : > { %4716 = vmatprep.subr.bf16.mxu1 %v5064_v5 }
0x141d   : > { %4718 = vmatpush3.bf16.msra.mxu1 %v4717_v9 }
0x141e   : > { %4719 = vmatprep.subr.bf16.mxu1 %v5064_v5 }
0x14eb   : > { %v4511_v53 = vpop.f32.mrb[20].mxu1 }
0x14ec   : > { %v3571_v54 = vadd.f32 %v4511_v53, %v4125_v52  ;;  %v3565_v55 = vpop.f32.mrb[21].mxu1 }
0x14ed   : > { %v3566_v56 = vadd.f32 %v4125_v52, %v3565_v55 }
0x14ee   : > { %v3575_v57 = vmax.f32 %v3571_v54, 0.0 }
0x14ef   : > { %v3574_v33 = vmax.f32 %v3566_v56, 0.0 }
0x14f1   : > { %4528 = vmatprep.mubr.msk.f32.mxu0 %vm2049_vm11, %v3574_v33 }
0x14f2   : > { %4529 = vmatmul.mubr.msk.f32.vlgmr.msra.gmra.mrb[24].mxu0 %vm2049_vm11, %v3575_v57 }
0x15c5   : > { %v4530_v59 = vpop.f32.mrb[24].mxu0 }
0x15c6   : > { %v3665_v60 = vpop.f32.mrb[25].mxu0 }
0x15c7   : > { %v3666_v61 = vadd.f32 %v4137_v58, %v3665_v60 }
0x15c9   : > { %v3673_v13 = vadd.f32 %v3666_v61, %v3478_v46 }
0x15cb   : > { %v3678_v62 = vsel %vm641_vm0, %v3673_v13, 0.0 }
0x15cc   : > { %3679 = vadd.xlane.f32.xlu0 %v3678_v62 }
0x1659   : > { %v3680_v63 = vpop.xlane.xlu0 %3679 }
0x165a   : > { %v3681_v0 = vmul.f32 0.03125, %v3680_v63 }
0x165c   : > { %v3682_v1 = vsub.f32 %v3673_v13, %v3681_v0 }
0x165e   : > { %v3683_v2 = vmul.f32 %v3682_v1, %v3682_v1 }
0x1660   : > { %v3684_v3 = vsel %vm641_vm0, %v3683_v2, 0.0 }
0x1661   : > { %3685 = vadd.xlane.f32.xlu0 %v3684_v3 }
0x16ee   : > { %v3686_v14 = vpop.xlane.xlu0 %3685 }
0x16ef   : > { %v3687_v15 = vmul.f32 0.03125, %v3686_v14 }
0x16f1   : > { %v3688_v16 = vadd.f32 1e-05, %v3687_v15 }
0x16f3   : > { %4953 = vrsqrt.f32 %v3688_v16 }
0x16fd   : > { %v4954_v27 = vpop.eup %4953 }
0x16fe   : > { %v3690_v18 = vmul.f32 %v4954_v27, %v3682_v1 }
0x1700   : > { %v3697_v22 = vmul.f32 %v4142_v25, %v3690_v18 }
0x1702   : > { %v3704_v10 = vadd.f32 %v4143_v21, %v3697_v22 }
0x1704   : > { %4540 = vmatmul.mubr.msk.f32.vlgmr.msra.gmra.mrb[22].mxu1 %vm641_vm0, %v3704_v10  ;;  %v3802_v28 = vrot.slane %v3704_v10, 2 }
0x1705   : > { %4721 = vmatpush3.bf16.msra.mxu1 %v4720_v23  ;;  %4550 = vmatprep.mubr.msk.f32.mxu1 %vm5065_vm12, %v5066_v11 }
0x1706   : > { %4722 = vmatprep.subr.bf16.mxu1 %v5064_v5 }
0x1709   : > { %4724 = vmatpush3.bf16.msra.mxu1 %v4723_v26 }
0x170c   : > { %4551 = vmatmul.mubr.msk.f32.vlgmr.msra.gmra.mrb[24].mxu1 %vm641_vm0, %v3802_v28 }
0x17d7   : > { %v3785_v31 = vpop.f32.mrb[22].mxu1 }
0x17d8   : > { %v3786_v34 = vadd.f32 %v4144_v29, %v3785_v31  ;;  %v4541_v35 = vpop.f32.mrb[23].mxu1 }
0x17da   : > { %3790 = vst.msk [vmem:[%s610_s25] sm:$0x3] %vm3789_vm13, %v3786_v34 }
0x17db   : > { %4968 = shalt.err (!%p4965_p3)
}
0x17dc   : > { %s4969_s25 = scalar_lea.hbm %s5755_s20, 32  ;;  %s4973_s0 = scalar_lea.hbm %s5854_s18, 64 }
0x17dd   : > { %p4970_p4 = scmp.ne.s32.totalorder %s5755_s20, %s4969_s25  ;;  %p4974_p9 = scmp.lt.u32.totalorder %s5755_s20, %s5854_s18 }
0x17de   : > { %p4975_p10 = scmp.lt.u32.totalorder %s4973_s0, %s4969_s25  ;;  %p4977_p12 = scmp.lt.u32.totalorder %s4969_s25, %s5755_s20 }
0x17df   : > { %p4971_p7 = pnand %p4970_p4, %p5207_p5 }
0x17e0   : > { %p4976_p11 = por %p4975_p10, %p4974_p9 }
0x17e1   : > { %p4972_p8 = pneg %p4971_p7 }
0x17e2   : > { %p4978_p13 = por %p4977_p12, %p4976_p11 }
0x17e4   : > { %p4979_p0 = pnand %p4978_p13, %p4972_p8 }
0x17e6   : > { %4982 = shalt.err (!%p4979_p0)
}
0x17e7   : > { %4737 = dma.vmem_to_hbm [thread:$0]  (%p5207_p5), %s5757_s28, 32, %s5755_s20, %s3877_s21   ;;  %v4146_v36 = vld [vmem:[%s5853_s17] ss:$0 sm:$0xff]  ;;  %v3871_v38 = vpop.f32.mrb[24].mxu1 }
0x17e8   : > { %s5917_s27 = sshll.u32 %s5741_s2, 1  ;;  %v3872_v32 = vadd.f32 %v4146_v36, %v3871_v38  ;;  %v4552_v39 = vpop.f32.mrb[25].mxu1  ;;  %s5918_s25 = sshll.u32 %s5190_s1, 5 }
0x17e9   : > { %s617_s22 = scalar_lea.vmem [#allocation4], %s5917_s27  ;;  %s5792_s6 = scalar_lea.hbm %s5855_s19, %s5918_s25 }
0x17ea   : > { %s3908_s23 = sshll.u32 %s617_s22, 4  ;;  %3875 = vst.msk [vmem:[%s617_s22] sm:$0x3] %vm3789_vm13, %v3872_v32  ;;  %s3882_s28 = scalar_lea.sflag [#allocation5], %s5741_s2  ;;  %s5794_s23 = int_to_ptr.vmem [resolvable:$true] %s3908_s23 }
0x17eb   : > { %s4983_s20 = scalar_lea.vmem %s5794_s23, 32  ;;  %s5068_s21 = smov [#allocation4]  }
0x17ec   : > { %p4984_p1 = scmp.ne.s32.totalorder %s5794_s23, %s4983_s20  ;;  %s4987_s1 = sshll.u32 %s5068_s21, 4  ;;  %s4988_s1 = int_to_ptr.vmem [resolvable:$false] %s4987_s1 }
0x17ed   : > { %s4989_s5 = scalar_lea.vmem %s4988_s1, 64  ;;  %p4990_p4 = scmp.lt.s32.totalorder %s5794_s23, %s4988_s1 }
0x17ee   : > { %p4985_p2 = pnand %p4984_p1, %p5207_p5  ;;  %p4991_p7 = scmp.lt.s32.totalorder %s4989_s5, %s4983_s20 }
0x17f0   : > { %p4986_p3 = pneg %p4985_p2  ;;  %p4992_p8 = por %p4991_p7, %p4990_p4 }
0x17f2   : > { %p4993_p9 = pnand %p4992_p8, %p4986_p3 }
0x17f4   : > { %4996 = shalt.err (!%p4993_p9)
}
0x17f5   : > { %s4997_s2 = scalar_lea.hbm %s5792_s6, 32  ;;  %s5001_s22 = scalar_lea.hbm %s5855_s19, 64 }
0x17f6   : > { %p4998_p10 = scmp.ne.s32.totalorder %s5792_s6, %s4997_s2  ;;  %p5002_p13 = scmp.lt.u32.totalorder %s5792_s6, %s5855_s19 }
0x17f7   : > { %p5003_p0 = scmp.lt.u32.totalorder %s5001_s22, %s4997_s2  ;;  %p5005_p2 = scmp.lt.u32.totalorder %s4997_s2, %s5792_s6 }
0x17f8   : > { %p4999_p11 = pnand %p4998_p10, %p5207_p5 }
0x17f9   : > { %p5004_p1 = por %p5003_p0, %p5002_p13 }
0x17fa   : > { %p5000_p12 = pneg %p4999_p11 }
0x17fb   : > { %p5006_p3 = por %p5005_p2, %p5004_p1 }
0x17fd   : > { %p5007_p4 = pnand %p5006_p3, %p5000_p12 }
0x17ff   : > { %5010 = shalt.err (!%p5007_p4)
}
0x1800   : > { %4738 = dma.vmem_to_hbm [thread:$0]  (%p5207_p5), %s5794_s23, 32, %s5792_s6, %s3882_s28  }
0x1801 PF: > { %s5919_s4 = sld [smem:[#allocation10_spill]]  ;;  %s5920_s20 = sld [smem:[#allocation8_spill]] }
0x1807   : > { %p4748_p7 = scmp.ge.s32.totalorder %s5919_s4, 2  ;;  %s3920_s1 = sand.u32 1, %s5920_s20  }
0x1808   : > { %s3921_s5 = scalar_lea.sflag [#allocation3], %s3920_s1 }
0x1809   : > { %p4742_p8 = pnand %p4748_p7, %p5211_p6 }
0x180b   : > { %5028 = dma.done.wait (!%p4742_p8), %s3921_s5, 32  }
0x180c   : > { %5030 = vsyncadd (!%p4742_p8), %s3921_s5, 4294967264  ;;  %s3930_s2 = scalar_lea.sflag [#allocation5], %s3920_s1 }
0x180d   : > { %5032 = dma.done.wait (!%p4742_p8), %s3930_s2, 32  }
0x180e   : > { %5034 = vsyncadd (!%p4742_p8), %s3930_s2, 4294967264  ;;  %s5922_s21 = sld [smem:[#allocation11_spill]]  ;;  %s5923_s3 = sld [smem:[#allocation9_spill]] }
0x180f   : > { %s5924_s20 = sld [smem:[#allocation12_spill]]  ;;  %s5925_s0 = smov %s5041_s30 }
0x1814   : > { %p33_p5 = scmp.ge.s32.totalorder %s5922_s21, 4   ;;  %s5926_s30 = smov %s5923_s3 }
0x1816   :  { %35 = sbr.rel (!%p33_p5) target bundleno = 13 (0xd), region = 159 }
0x181d   :  { %3935 = vsyncpa [#allocation3], 1 }
0x181e   :  { %3937 = vsyncpa [#allocation3 + $0x1], 1 }
0x181f   :  { %3938 = vsyncpa [#allocation5], 1 }
0x1820   :  { %3940 = vsyncpa [#allocation5 + $0x1], 1 }

</bundles_post_ra>
